<compile_context>
chip_gen: v6e
topology: v6e:2x2x1
jax: 0.10.0
libtpu: 0.0.40
codegen_flags: <defaults>
</compile_context>

<pallas_src>
import jax
import jax.numpy as jnp
from jax import lax
from jax.experimental import pallas as pl
from jax.experimental.pallas import tpu as pltpu

BBOX_DIM = 4
OBJECTNESS_DIM = 1
NEG_SLOPE = 0.1  # LeakyReLU slope used by conv_bn_relu_block


def yolo_kernel(x_ref, we_ref, be_ref, wr_ref, br_ref, o_ref, pad_ref):
    """Fused extra_convs + regressor for one batch element.

    x_ref  : (1, H, W, C)   bf16  input features (backbone output)
    we_ref : (L, 9*C, C)    bf16  BN-folded 3x3 conv weights, im2col layout
    be_ref : (L, 1, C)      f32   BN-folded per-layer bias
    wr_ref : (C, Rp)        bf16  1x1 regressor weight (lane-padded to Rp)
    br_ref : (1, Rp)        f32   regressor bias (lane-padded)
    o_ref  : (1, H, W, Rp)  f32   output
    pad_ref: (H+2, W+2, C)  f32   zero-padded activation scratch (VMEM)
    """
    H, W, C = x_ref.shape[1], x_ref.shape[2], x_ref.shape[3]
    L = we_ref.shape[0]
    HW = H * W

    # Zero the padded scratch every grid step.  Cheap (tiny scratch) and — unlike
    # a program_id(0)==0 guard — correct when the "parallel" batch axis is split
    # across TensorCores on v7x (the second core never sees grid index 0).
    pad_ref[...] = jnp.zeros_like(pad_ref)
    pad_ref[1:H + 1, 1:W + 1, :] = x_ref[0].astype(jnp.float32)

    # extra_convs: L x (conv3x3 + folded BN + LeakyReLU), one MXU matmul each.
    act = None
    for l in range(L):
        # im2col: 9 shifted views concatenated along K (tap = dh*3 + dw).
        cols = [
            pad_ref[dh:dh + H, dw:dw + W, :].reshape(HW, C)
            for dh in range(3) for dw in range(3)
        ]
        col = jnp.concatenate(cols, axis=-1).astype(jnp.bfloat16)  # (HW, 9*C)
        acc = jnp.dot(col, we_ref[l],
                      preferred_element_type=jnp.float32)          # (HW, C) f32
        acc = acc + be_ref[l]                                      # folded BN bias
        act = jnp.maximum(acc, NEG_SLOPE * acc)                    # LeakyReLU, f32
        if l + 1 < L:
            # Only intermediate layers need to go back into the padded scratch;
            # the last layer feeds the 1x1 regressor directly.
            pad_ref[1:H + 1, 1:W + 1, :] = act.reshape(H, W, C)

    # regressor: 1x1 conv with bias (lane-padded output channels).
    if L > 0:
        feat = act.astype(jnp.bfloat16)                            # (HW, C)
    else:
        feat = x_ref[0].reshape(HW, C)
    out = jnp.dot(feat, wr_ref[...], preferred_element_type=jnp.float32) + br_ref[...]
    o_ref[0] = out.reshape(H, W, -1).astype(o_ref.dtype)


def yolo_forward(x_nchw, we, be, wr, br):
    """Wrapper: NCHW in / NCHW out (PyTorch convention); kernel runs NHWC.

    # TODO(synk): in production accept NHWC straight from the backbone to avoid
    # the HBM round-trip transposes around the fused kernel.
    """
    N, C, H, W = x_nchw.shape
    L = we.shape[0]
    R = wr.shape[1]
    Rp = pl.cdiv(R, 128) * 128  # lane-dense output width (unmasked stores)

    # Kernel-layout params, prepared once in the wrapper (not inside the kernel).
    x = jnp.transpose(x_nchw, (0, 2, 3, 1)).astype(jnp.bfloat16)        # NHWC, bf16
    we_k = we.reshape(L, 9 * C, C).astype(jnp.bfloat16)                 # im2col weight
    be_k = be.astype(jnp.float32)
    wr_k = jnp.zeros((C, Rp), jnp.bfloat16).at[:, :R].set(wr.astype(jnp.bfloat16))
    br_k = jnp.zeros((1, Rp), jnp.float32).at[:, :R].set(br.astype(jnp.float32))

    out_nhwr = pl.pallas_call(
        yolo_kernel,
        out_shape=jax.ShapeDtypeStruct((N, H, W, Rp), jnp.float32),
        grid_spec=pltpu.PrefetchScalarGridSpec(
            num_scalar_prefetch=0,
            grid=(N,),
            in_specs=[
                pl.BlockSpec((1, H, W, C), lambda n: (n, 0, 0, 0)),
                pl.BlockSpec((L, 9 * C, C), lambda n: (0, 0, 0)),
                pl.BlockSpec((L, 1, C), lambda n: (0, 0, 0)),
                pl.BlockSpec((C, Rp), lambda n: (0, 0)),
                pl.BlockSpec((1, Rp), lambda n: (0, 0)),
            ],
            out_specs=pl.BlockSpec((1, H, W, Rp), lambda n: (n, 0, 0, 0)),
            scratch_shapes=[pltpu.VMEM((H + 2, W + 2, C), jnp.float32)],
        ),
        compiler_params=pltpu.CompilerParams(dimension_semantics=("parallel",)),
    )(x, we_k, be_k, wr_k, br_k)

    out = out_nhwr[..., :R]                      # drop lane padding
    return jnp.transpose(out, (0, 3, 1, 2))      # back to NCHW


def init_params(key, C, L, R):
    """Deterministic msra-style init with eval-mode BN folded into the conv."""
    keys = jax.random.split(key, 6)
    eps = 1e-5
    # 3x3 convs (no bias in conv_bn_relu_block) + BatchNorm params.
    std3 = (2.0 / (9 * C)) ** 0.5
    w_raw = jax.random.normal(keys[0], (L, 3, 3, C, C), jnp.float32) * std3  # HWIO
    gamma = 1.0 + 0.1 * jax.random.normal(keys[1], (L, C), jnp.float32)
    beta = 0.1 * jax.random.normal(keys[2], (L, C), jnp.float32)
    running_mean = 0.1 * jax.random.normal(keys[3], (L, C), jnp.float32)
    running_var = jnp.abs(1.0 + 0.1 * jax.random.normal(keys[4], (L, C), jnp.float32))
    scale = gamma / jnp.sqrt(running_var + eps)                  # per out-channel
    we = (w_raw * scale[:, None, None, None, :]).reshape(L, 9, C, C)
    be = (beta - running_mean * scale).reshape(L, 1, C)
    # 1x1 regressor conv (msra weight, zero bias).
    std1 = (2.0 / C) ** 0.5
    wr = jax.random.normal(keys[5], (C, R), jnp.float32) * std1
    br = jnp.zeros((1, R), jnp.float32)
    return we, be, wr, br


def ref_forward(x_nchw, we, be, wr, br):
    """Pure-JAX reference matching the kernel numerics (bf16 MXU inputs, f32 accum)."""
    L, C = we.shape[0], we.shape[2]
    R = wr.shape[1]
    x = jnp.transpose(x_nchw, (0, 2, 3, 1)).astype(jnp.float32)  # NHWC
    for l in range(L):
        w_hwio = we[l].reshape(3, 3, C, C).astype(jnp.bfloat16)
        y = lax.conv_general_dilated(
            x.astype(jnp.bfloat16), w_hwio, (1, 1), 'SAME',
            dimension_numbers=('NHWC', 'HWIO', 'NHWC'),
            preferred_element_type=jnp.float32)
        y = y + be[l].reshape(1, 1, 1, C)
        x = jnp.where(y > 0, y, NEG_SLOPE * y)
    out = jnp.einsum('nhwc,cr->nhwr', x.astype(jnp.bfloat16),
                     wr.astype(jnp.bfloat16),
                     preferred_element_type=jnp.float32) + br.reshape(1, 1, 1, R)
    return jnp.transpose(out, (0, 3, 1, 2))


if __name__ == "__main__":
    # Small, module-consistent shapes.
    N, C, H, W = 2, 32, 8, 8            # backbone_out_planes = 32
    num_classes, num_extra_convs, num_anchors = 20, 3, 5
    R = num_anchors * (num_classes + BBOX_DIM + OBJECTNESS_DIM)  # 125

    key = jax.random.PRNGKey(0)
    kx, kp = jax.random.split(key)
    # backbone treated as identity: x already has backbone_out_planes channels (NCHW).
    x = jax.random.normal(kx, (N, C, H, W), jnp.float32)
    we, be, wr, br = init_params(kp, C, num_extra_convs, R)

    out = jax.block_until_ready(yolo_forward(x, we, be, wr, br))
    assert out.shape == (N, R, H, W), out.shape

    ref = jax.block_until_ready(ref_forward(x, we, be, wr, br))
    max_err = float(jnp.max(jnp.abs(out - ref)))
    assert jnp.allclose(out, ref, rtol=2e-2, atol=2e-2), max_err

    print("KERNEL_OK")
</pallas_src>

<mosaic_0001>
module attributes {stable_mosaic.version = 11 : i64} {
  func.func @yolo_kernel(%arg0: i32, %arg1: memref<1x8x8x32xbf16, #tpu.memory_space<vmem>>, %arg2: memref<3x288x32xbf16, #tpu.memory_space<vmem>>, %arg3: memref<3x1x32xf32, #tpu.memory_space<vmem>>, %arg4: memref<32x128xbf16, #tpu.memory_space<vmem>>, %arg5: memref<1x128xf32, #tpu.memory_space<vmem>>, %arg6: memref<1x8x8x128xf32, #tpu.memory_space<vmem>>, %arg7: memref<10x10x32xf32, #tpu.memory_space<vmem>>) attributes {dimension_semantics = [#tpu.dimension_semantics<parallel>], iteration_bounds = array<i64: 2>, scalar_prefetch = 0 : i64, scratch_operands = 1 : i64, tpu.core_type = #tpu.core_type<tc>, window_params = [{transform_indices = @transform_0, window_bounds = array<i64: 1, 8, 8, 32>}, {pipeline_mode = #tpu.pipeline_mode<synchronous>, transform_indices = @transform_1, window_bounds = array<i64: 3, 288, 32>}, {pipeline_mode = #tpu.pipeline_mode<synchronous>, transform_indices = @transform_2, window_bounds = array<i64: 3, 1, 32>}, {pipeline_mode = #tpu.pipeline_mode<synchronous>, transform_indices = @transform_3, window_bounds = array<i64: 32, 128>}, {pipeline_mode = #tpu.pipeline_mode<synchronous>, transform_indices = @transform_4, window_bounds = array<i64: 1, 128>}, {transform_indices = @transform_5, window_bounds = array<i64: 1, 8, 8, 128>}]} {
    %cst = arith.constant 0.000000e+00 : f32
    %0 = vector.broadcast %cst : f32 to vector<10x10x32xf32>
    %c0 = arith.constant 0 : index
    %c0_0 = arith.constant 0 : index
    %c0_1 = arith.constant 0 : index
    %1 = vector.load %arg7[%c0, %c0_0, %c0_1] : memref<10x10x32xf32, #tpu.memory_space<vmem>>, vector<10x10x32xf32>
    tpu.vector_store %arg7[%c0, %c0_0, %c0_1], %0 {strides = array<i32>} : memref<10x10x32xf32, #tpu.memory_space<vmem>>, vector<10x10x32xf32>,
    %c0_2 = arith.constant 0 : index
    %c0_3 = arith.constant 0 : index
    %c0_4 = arith.constant 0 : index
    %c0_5 = arith.constant 0 : index
    %2 = vector.load %arg1[%c0_2, %c0_3, %c0_4, %c0_5] : memref<1x8x8x32xbf16, #tpu.memory_space<vmem>>, vector<1x8x8x32xbf16>
    %3 = vector.shape_cast %2 : vector<1x8x8x32xbf16> to vector<8x8x32xbf16>
    %4 = arith.extf %3 : vector<8x8x32xbf16> to vector<8x8x32xf32>
    %c1 = arith.constant 1 : index
    %c1_6 = arith.constant 1 : index
    %c0_7 = arith.constant 0 : index
    %5 = vector.load %arg7[%c1, %c1_6, %c0_7] : memref<10x10x32xf32, #tpu.memory_space<vmem>>, vector<8x8x32xf32>
    tpu.vector_store %arg7[%c1, %c1_6, %c0_7], %4 {strides = array<i32>} : memref<10x10x32xf32, #tpu.memory_space<vmem>>, vector<8x8x32xf32>,
    %c0_8 = arith.constant 0 : index
    %c0_9 = arith.constant 0 : index
    %c0_10 = arith.constant 0 : index
    %6 = vector.load %arg7[%c0_8, %c0_9, %c0_10] : memref<10x10x32xf32, #tpu.memory_space<vmem>>, vector<8x8x32xf32>
    %7 = vector.shape_cast %6 : vector<8x8x32xf32> to vector<64x32xf32>
    %c0_11 = arith.constant 0 : index
    %c1_12 = arith.constant 1 : index
    %c0_13 = arith.constant 0 : index
    %8 = vector.load %arg7[%c0_11, %c1_12, %c0_13] : memref<10x10x32xf32, #tpu.memory_space<vmem>>, vector<8x8x32xf32>
    %9 = vector.shape_cast %8 : vector<8x8x32xf32> to vector<64x32xf32>
    %c0_14 = arith.constant 0 : index
    %c2 = arith.constant 2 : index
    %c0_15 = arith.constant 0 : index
    %10 = vector.load %arg7[%c0_14, %c2, %c0_15] : memref<10x10x32xf32, #tpu.memory_space<vmem>>, vector<8x8x32xf32>
    %11 = vector.shape_cast %10 : vector<8x8x32xf32> to vector<64x32xf32>
    %c1_16 = arith.constant 1 : index
    %c0_17 = arith.constant 0 : index
    %c0_18 = arith.constant 0 : index
    %12 = vector.load %arg7[%c1_16, %c0_17, %c0_18] : memref<10x10x32xf32, #tpu.memory_space<vmem>>, vector<8x8x32xf32>
    %13 = vector.shape_cast %12 : vector<8x8x32xf32> to vector<64x32xf32>
    %c1_19 = arith.constant 1 : index
    %c1_20 = arith.constant 1 : index
    %c0_21 = arith.constant 0 : index
    %14 = vector.load %arg7[%c1_19, %c1_20, %c0_21] : memref<10x10x32xf32, #tpu.memory_space<vmem>>, vector<8x8x32xf32>
    %15 = vector.shape_cast %14 : vector<8x8x32xf32> to vector<64x32xf32>
    %c1_22 = arith.constant 1 : index
    %c2_23 = arith.constant 2 : index
    %c0_24 = arith.constant 0 : index
    %16 = vector.load %arg7[%c1_22, %c2_23, %c0_24] : memref<10x10x32xf32, #tpu.memory_space<vmem>>, vector<8x8x32xf32>
    %17 = vector.shape_cast %16 : vector<8x8x32xf32> to vector<64x32xf32>
    %c2_25 = arith.constant 2 : index
    %c0_26 = arith.constant 0 : index
    %c0_27 = arith.constant 0 : index
    %18 = vector.load %arg7[%c2_25, %c0_26, %c0_27] : memref<10x10x32xf32, #tpu.memory_space<vmem>>, vector<8x8x32xf32>
    %19 = vector.shape_cast %18 : vector<8x8x32xf32> to vector<64x32xf32>
    %c2_28 = arith.constant 2 : index
    %c1_29 = arith.constant 1 : index
    %c0_30 = arith.constant 0 : index
    %20 = vector.load %arg7[%c2_28, %c1_29, %c0_30] : memref<10x10x32xf32, #tpu.memory_space<vmem>>, vector<8x8x32xf32>
    %21 = vector.shape_cast %20 : vector<8x8x32xf32> to vector<64x32xf32>
    %c2_31 = arith.constant 2 : index
    %c2_32 = arith.constant 2 : index
    %c0_33 = arith.constant 0 : index
    %22 = vector.load %arg7[%c2_31, %c2_32, %c0_33] : memref<10x10x32xf32, #tpu.memory_space<vmem>>, vector<8x8x32xf32>
    %23 = vector.shape_cast %22 : vector<8x8x32xf32> to vector<64x32xf32>
    %24 = tpu.concatenate %7, %9, %11, %13, %15, %17, %19, %21, %23 in 1 : vector<64x32xf32>, vector<64x32xf32>, vector<64x32xf32>, vector<64x32xf32>, vector<64x32xf32>, vector<64x32xf32>, vector<64x32xf32>, vector<64x32xf32>, vector<64x32xf32> -> vector<64x288xf32>
    %25 = arith.truncf %24 : vector<64x288xf32> to vector<64x288xbf16>
    %c0_34 = arith.constant 0 : index
    %c0_35 = arith.constant 0 : index
    %c0_36 = arith.constant 0 : index
    %26 = vector.load %arg2[%c0_34, %c0_35, %c0_36] : memref<3x288x32xbf16, #tpu.memory_space<vmem>>, vector<1x288x32xbf16>
    %27 = vector.shape_cast %26 : vector<1x288x32xbf16> to vector<288x32xbf16>
    %cst_37 = arith.constant dense<0.000000e+00> : vector<64x32xf32>
    %28 = tpu.matmul %25, %27, %cst_37 {dimension_numbers = #tpu.dot_dimension_numbers<[1], [0], [0], [1], [0, 0, 1, 1], [], []>} : vector<64x288xbf16>, vector<288x32xbf16>, vector<64x32xf32> -> vector<64x32xf32>
    %c0_38 = arith.constant 0 : index
    %c0_39 = arith.constant 0 : index
    %c0_40 = arith.constant 0 : index
    %29 = vector.load %arg3[%c0_38, %c0_39, %c0_40] : memref<3x1x32xf32, #tpu.memory_space<vmem>>, vector<1x1x32xf32>
    %30 = vector.shape_cast %29 : vector<1x1x32xf32> to vector<1x32xf32>
    %31 = vector.broadcast %30 : vector<1x32xf32> to vector<64x32xf32>
    %32 = arith.addf %28, %31 : vector<64x32xf32>
    %cst_41 = arith.constant 1.000000e-01 : f32
    %33 = vector.broadcast %cst_41 : f32 to vector<64x32xf32>
    %34 = arith.mulf %33, %32 : vector<64x32xf32>
    %35 = arith.maximumf %32, %34 : vector<64x32xf32>
    %36 = vector.shape_cast %35 : vector<64x32xf32> to vector<8x8x32xf32>
    %c1_42 = arith.constant 1 : index
    %c1_43 = arith.constant 1 : index
    %c0_44 = arith.constant 0 : index
    %37 = vector.load %arg7[%c1_42, %c1_43, %c0_44] : memref<10x10x32xf32, #tpu.memory_space<vmem>>, vector<8x8x32xf32>
    tpu.vector_store %arg7[%c1_42, %c1_43, %c0_44], %36 {strides = array<i32>} : memref<10x10x32xf32, #tpu.memory_space<vmem>>, vector<8x8x32xf32>,
    %c0_45 = arith.constant 0 : index
    %c0_46 = arith.constant 0 : index
    %c0_47 = arith.constant 0 : index
    %38 = vector.load %arg7[%c0_45, %c0_46, %c0_47] : memref<10x10x32xf32, #tpu.memory_space<vmem>>, vector<8x8x32xf32>
    %39 = vector.shape_cast %38 : vector<8x8x32xf32> to vector<64x32xf32>
    %c0_48 = arith.constant 0 : index
    %c1_49 = arith.constant 1 : index
    %c0_50 = arith.constant 0 : index
    %40 = vector.load %arg7[%c0_48, %c1_49, %c0_50] : memref<10x10x32xf32, #tpu.memory_space<vmem>>, vector<8x8x32xf32>
    %41 = vector.shape_cast %40 : vector<8x8x32xf32> to vector<64x32xf32>
    %c0_51 = arith.constant 0 : index
    %c2_52 = arith.constant 2 : index
    %c0_53 = arith.constant 0 : index
    %42 = vector.load %arg7[%c0_51, %c2_52, %c0_53] : memref<10x10x32xf32, #tpu.memory_space<vmem>>, vector<8x8x32xf32>
    %43 = vector.shape_cast %42 : vector<8x8x32xf32> to vector<64x32xf32>
    %c1_54 = arith.constant 1 : index
    %c0_55 = arith.constant 0 : index
    %c0_56 = arith.constant 0 : index
    %44 = vector.load %arg7[%c1_54, %c0_55, %c0_56] : memref<10x10x32xf32, #tpu.memory_space<vmem>>, vector<8x8x32xf32>
    %45 = vector.shape_cast %44 : vector<8x8x32xf32> to vector<64x32xf32>
    %c1_57 = arith.constant 1 : index
    %c1_58 = arith.constant 1 : index
    %c0_59 = arith.constant 0 : index
    %46 = vector.load %arg7[%c1_57, %c1_58, %c0_59] : memref<10x10x32xf32, #tpu.memory_space<vmem>>, vector<8x8x32xf32>
    %47 = vector.shape_cast %46 : vector<8x8x32xf32> to vector<64x32xf32>
    %c1_60 = arith.constant 1 : index
    %c2_61 = arith.constant 2 : index
    %c0_62 = arith.constant 0 : index
    %48 = vector.load %arg7[%c1_60, %c2_61, %c0_62] : memref<10x10x32xf32, #tpu.memory_space<vmem>>, vector<8x8x32xf32>
    %49 = vector.shape_cast %48 : vector<8x8x32xf32> to vector<64x32xf32>
    %c2_63 = arith.constant 2 : index
    %c0_64 = arith.constant 0 : index
    %c0_65 = arith.constant 0 : index
    %50 = vector.load %arg7[%c2_63, %c0_64, %c0_65] : memref<10x10x32xf32, #tpu.memory_space<vmem>>, vector<8x8x32xf32>
    %51 = vector.shape_cast %50 : vector<8x8x32xf32> to vector<64x32xf32>
    %c2_66 = arith.constant 2 : index
    %c1_67 = arith.constant 1 : index
    %c0_68 = arith.constant 0 : index
    %52 = vector.load %arg7[%c2_66, %c1_67, %c0_68] : memref<10x10x32xf32, #tpu.memory_space<vmem>>, vector<8x8x32xf32>
    %53 = vector.shape_cast %52 : vector<8x8x32xf32> to vector<64x32xf32>
    %c2_69 = arith.constant 2 : index
    %c2_70 = arith.constant 2 : index
    %c0_71 = arith.constant 0 : index
    %54 = vector.load %arg7[%c2_69, %c2_70, %c0_71] : memref<10x10x32xf32, #tpu.memory_space<vmem>>, vector<8x8x32xf32>
    %55 = vector.shape_cast %54 : vector<8x8x32xf32> to vector<64x32xf32>
    %56 = tpu.concatenate %39, %41, %43, %45, %47, %49, %51, %53, %55 in 1 : vector<64x32xf32>, vector<64x32xf32>, vector<64x32xf32>, vector<64x32xf32>, vector<64x32xf32>, vector<64x32xf32>, vector<64x32xf32>, vector<64x32xf32>, vector<64x32xf32> -> vector<64x288xf32>
    %57 = arith.truncf %56 : vector<64x288xf32> to vector<64x288xbf16>
    %c1_72 = arith.constant 1 : index
    %c0_73 = arith.constant 0 : index
    %c0_74 = arith.constant 0 : index
    %58 = vector.load %arg2[%c1_72, %c0_73, %c0_74] : memref<3x288x32xbf16, #tpu.memory_space<vmem>>, vector<1x288x32xbf16>
    %59 = vector.shape_cast %58 : vector<1x288x32xbf16> to vector<288x32xbf16>
    %cst_75 = arith.constant dense<0.000000e+00> : vector<64x32xf32>
    %60 = tpu.matmul %57, %59, %cst_75 {dimension_numbers = #tpu.dot_dimension_numbers<[1], [0], [0], [1], [0, 0, 1, 1], [], []>} : vector<64x288xbf16>, vector<288x32xbf16>, vector<64x32xf32> -> vector<64x32xf32>
    %c1_76 = arith.constant 1 : index
    %c0_77 = arith.constant 0 : index
    %c0_78 = arith.constant 0 : index
    %61 = vector.load %arg3[%c1_76, %c0_77, %c0_78] : memref<3x1x32xf32, #tpu.memory_space<vmem>>, vector<1x1x32xf32>
    %62 = vector.shape_cast %61 : vector<1x1x32xf32> to vector<1x32xf32>
    %63 = vector.broadcast %62 : vector<1x32xf32> to vector<64x32xf32>
    %64 = arith.addf %60, %63 : vector<64x32xf32>
    %cst_79 = arith.constant 1.000000e-01 : f32
    %65 = vector.broadcast %cst_79 : f32 to vector<64x32xf32>
    %66 = arith.mulf %65, %64 : vector<64x32xf32>
    %67 = arith.maximumf %64, %66 : vector<64x32xf32>
    %68 = vector.shape_cast %67 : vector<64x32xf32> to vector<8x8x32xf32>
    %c1_80 = arith.constant 1 : index
    %c1_81 = arith.constant 1 : index
    %c0_82 = arith.constant 0 : index
    %69 = vector.load %arg7[%c1_80, %c1_81, %c0_82] : memref<10x10x32xf32, #tpu.memory_space<vmem>>, vector<8x8x32xf32>
    tpu.vector_store %arg7[%c1_80, %c1_81, %c0_82], %68 {strides = array<i32>} : memref<10x10x32xf32, #tpu.memory_space<vmem>>, vector<8x8x32xf32>,
    %c0_83 = arith.constant 0 : index
    %c0_84 = arith.constant 0 : index
    %c0_85 = arith.constant 0 : index
    %70 = vector.load %arg7[%c0_83, %c0_84, %c0_85] : memref<10x10x32xf32, #tpu.memory_space<vmem>>, vector<8x8x32xf32>
    %71 = vector.shape_cast %70 : vector<8x8x32xf32> to vector<64x32xf32>
    %c0_86 = arith.constant 0 : index
    %c1_87 = arith.constant 1 : index
    %c0_88 = arith.constant 0 : index
    %72 = vector.load %arg7[%c0_86, %c1_87, %c0_88] : memref<10x10x32xf32, #tpu.memory_space<vmem>>, vector<8x8x32xf32>
    %73 = vector.shape_cast %72 : vector<8x8x32xf32> to vector<64x32xf32>
    %c0_89 = arith.constant 0 : index
    %c2_90 = arith.constant 2 : index
    %c0_91 = arith.constant 0 : index
    %74 = vector.load %arg7[%c0_89, %c2_90, %c0_91] : memref<10x10x32xf32, #tpu.memory_space<vmem>>, vector<8x8x32xf32>
    %75 = vector.shape_cast %74 : vector<8x8x32xf32> to vector<64x32xf32>
    %c1_92 = arith.constant 1 : index
    %c0_93 = arith.constant 0 : index
    %c0_94 = arith.constant 0 : index
    %76 = vector.load %arg7[%c1_92, %c0_93, %c0_94] : memref<10x10x32xf32, #tpu.memory_space<vmem>>, vector<8x8x32xf32>
    %77 = vector.shape_cast %76 : vector<8x8x32xf32> to vector<64x32xf32>
    %c1_95 = arith.constant 1 : index
    %c1_96 = arith.constant 1 : index
    %c0_97 = arith.constant 0 : index
    %78 = vector.load %arg7[%c1_95, %c1_96, %c0_97] : memref<10x10x32xf32, #tpu.memory_space<vmem>>, vector<8x8x32xf32>
    %79 = vector.shape_cast %78 : vector<8x8x32xf32> to vector<64x32xf32>
    %c1_98 = arith.constant 1 : index
    %c2_99 = arith.constant 2 : index
    %c0_100 = arith.constant 0 : index
    %80 = vector.load %arg7[%c1_98, %c2_99, %c0_100] : memref<10x10x32xf32, #tpu.memory_space<vmem>>, vector<8x8x32xf32>
    %81 = vector.shape_cast %80 : vector<8x8x32xf32> to vector<64x32xf32>
    %c2_101 = arith.constant 2 : index
    %c0_102 = arith.constant 0 : index
    %c0_103 = arith.constant 0 : index
    %82 = vector.load %arg7[%c2_101, %c0_102, %c0_103] : memref<10x10x32xf32, #tpu.memory_space<vmem>>, vector<8x8x32xf32>
    %83 = vector.shape_cast %82 : vector<8x8x32xf32> to vector<64x32xf32>
    %c2_104 = arith.constant 2 : index
    %c1_105 = arith.constant 1 : index
    %c0_106 = arith.constant 0 : index
    %84 = vector.load %arg7[%c2_104, %c1_105, %c0_106] : memref<10x10x32xf32, #tpu.memory_space<vmem>>, vector<8x8x32xf32>
    %85 = vector.shape_cast %84 : vector<8x8x32xf32> to vector<64x32xf32>
    %c2_107 = arith.constant 2 : index
    %c2_108 = arith.constant 2 : index
    %c0_109 = arith.constant 0 : index
    %86 = vector.load %arg7[%c2_107, %c2_108, %c0_109] : memref<10x10x32xf32, #tpu.memory_space<vmem>>, vector<8x8x32xf32>
    %87 = vector.shape_cast %86 : vector<8x8x32xf32> to vector<64x32xf32>
    %88 = tpu.concatenate %71, %73, %75, %77, %79, %81, %83, %85, %87 in 1 : vector<64x32xf32>, vector<64x32xf32>, vector<64x32xf32>, vector<64x32xf32>, vector<64x32xf32>, vector<64x32xf32>, vector<64x32xf32>, vector<64x32xf32>, vector<64x32xf32> -> vector<64x288xf32>
    %89 = arith.truncf %88 : vector<64x288xf32> to vector<64x288xbf16>
    %c2_110 = arith.constant 2 : index
    %c0_111 = arith.constant 0 : index
    %c0_112 = arith.constant 0 : index
    %90 = vector.load %arg2[%c2_110, %c0_111, %c0_112] : memref<3x288x32xbf16, #tpu.memory_space<vmem>>, vector<1x288x32xbf16>
    %91 = vector.shape_cast %90 : vector<1x288x32xbf16> to vector<288x32xbf16>
    %cst_113 = arith.constant dense<0.000000e+00> : vector<64x32xf32>
    %92 = tpu.matmul %89, %91, %cst_113 {dimension_numbers = #tpu.dot_dimension_numbers<[1], [0], [0], [1], [0, 0, 1, 1], [], []>} : vector<64x288xbf16>, vector<288x32xbf16>, vector<64x32xf32> -> vector<64x32xf32>
    %c2_114 = arith.constant 2 : index
    %c0_115 = arith.constant 0 : index
    %c0_116 = arith.constant 0 : index
    %93 = vector.load %arg3[%c2_114, %c0_115, %c0_116] : memref<3x1x32xf32, #tpu.memory_space<vmem>>, vector<1x1x32xf32>
    %94 = vector.shape_cast %93 : vector<1x1x32xf32> to vector<1x32xf32>
    %95 = vector.broadcast %94 : vector<1x32xf32> to vector<64x32xf32>
    %96 = arith.addf %92, %95 : vector<64x32xf32>
    %cst_117 = arith.constant 1.000000e-01 : f32
    %97 = vector.broadcast %cst_117 : f32 to vector<64x32xf32>
    %98 = arith.mulf %97, %96 : vector<64x32xf32>
    %99 = arith.maximumf %96, %98 : vector<64x32xf32>
    %100 = arith.truncf %99 : vector<64x32xf32> to vector<64x32xbf16>
    %c0_118 = arith.constant 0 : index
    %c0_119 = arith.constant 0 : index
    %101 = vector.load %arg4[%c0_118, %c0_119] : memref<32x128xbf16, #tpu.memory_space<vmem>>, vector<32x128xbf16>
    %cst_120 = arith.constant dense<0.000000e+00> : vector<64x128xf32>
    %102 = tpu.matmul %100, %101, %cst_120 {dimension_numbers = #tpu.dot_dimension_numbers<[1], [0], [0], [1], [0, 0, 1, 1], [], []>} : vector<64x32xbf16>, vector<32x128xbf16>, vector<64x128xf32> -> vector<64x128xf32>
    %c0_121 = arith.constant 0 : index
    %c0_122 = arith.constant 0 : index
    %103 = vector.load %arg5[%c0_121, %c0_122] : memref<1x128xf32, #tpu.memory_space<vmem>>, vector<1x128xf32>
    %104 = vector.broadcast %103 : vector<1x128xf32> to vector<64x128xf32>
    %105 = arith.addf %102, %104 : vector<64x128xf32>
    %106 = vector.shape_cast %105 : vector<64x128xf32> to vector<8x8x128xf32>
    %c0_123 = arith.constant 0 : index
    %c0_124 = arith.constant 0 : index
    %c0_125 = arith.constant 0 : index
    %c0_126 = arith.constant 0 : index
    %107 = vector.load %arg6[%c0_123, %c0_124, %c0_125, %c0_126] : memref<1x8x8x128xf32, #tpu.memory_space<vmem>>, vector<1x8x8x128xf32>
    %108 = vector.shape_cast %107 : vector<1x8x8x128xf32> to vector<8x8x128xf32>
    %109 = vector.shape_cast %106 : vector<8x8x128xf32> to vector<1x8x8x128xf32>
    tpu.vector_store %arg6[%c0_123, %c0_124, %c0_125, %c0_126], %109 {strides = array<i32>} : memref<1x8x8x128xf32, #tpu.memory_space<vmem>>, vector<1x8x8x128xf32>,
    return
  }
  func.func @transform_0(%arg0: i32) -> (i32, i32, i32, i32) {
    %c0_i32 = arith.constant 0 : i32
    %c0_i32_0 = arith.constant 0 : i32
    %c0_i32_1 = arith.constant 0 : i32
    %c0_i32_2 = arith.constant 0 : i32
    return %arg0, %c0_i32, %c0_i32_0, %c0_i32_1 : i32, i32, i32, i32
  }
  func.func @transform_1(%arg0: i32) -> (i32, i32, i32) {
    %c0_i32 = arith.constant 0 : i32
    %c0_i32_0 = arith.constant 0 : i32
    %c0_i32_1 = arith.constant 0 : i32
    %c0_i32_2 = arith.constant 0 : i32
    return %c0_i32, %c0_i32_0, %c0_i32_1 : i32, i32, i32
  }
  func.func @transform_2(%arg0: i32) -> (i32, i32, i32) {
    %c0_i32 = arith.constant 0 : i32
    %c0_i32_0 = arith.constant 0 : i32
    %c0_i32_1 = arith.constant 0 : i32
    %c0_i32_2 = arith.constant 0 : i32
    return %c0_i32, %c0_i32_0, %c0_i32_1 : i32, i32, i32
  }
  func.func @transform_3(%arg0: i32) -> (i32, i32) {
    %c0_i32 = arith.constant 0 : i32
    %c0_i32_0 = arith.constant 0 : i32
    %c0_i32_1 = arith.constant 0 : i32
    return %c0_i32, %c0_i32_0 : i32, i32
  }
  func.func @transform_4(%arg0: i32) -> (i32, i32) {
    %c0_i32 = arith.constant 0 : i32
    %c0_i32_0 = arith.constant 0 : i32
    %c0_i32_1 = arith.constant 0 : i32
    return %c0_i32, %c0_i32_0 : i32, i32
  }
  func.func @transform_5(%arg0: i32) -> (i32, i32, i32, i32) {
    %c0_i32 = arith.constant 0 : i32
    %c0_i32_0 = arith.constant 0 : i32
    %c0_i32_1 = arith.constant 0 : i32
    %c0_i32_2 = arith.constant 0 : i32
    return %arg0, %c0_i32, %c0_i32_0, %c0_i32_1 : i32, i32, i32, i32
  }
}

</mosaic_0001>

<bundles_post_ra>
// kernel: tpu_custom_call.1
= control target key start
LH: loop header
LB: loop body
LE: loop exit
PB: predicated region body
PF: predicated region fallthrough
CT: control target
= control target key end

     0   :  { %10 = vsyncpa [#allocation4], 0  ;;  %s4128_s0 = inlined_call_operand.vmem [shape: bf16[2,8,8,32], index: 0, kind: input, shape index: {}]   ;;  %s4129_s1 = inlined_call_operand.vmem [shape: bf16[3,288,32], index: 1, kind: input, shape index: {}]   ;;  %s4130_s2 = inlined_call_operand.vmem [shape: f32[3,1,32], index: 2, kind: input, shape index: {}]   ;;  %s4131_s3 = inlined_call_operand.vmem [shape: bf16[32,128], index: 3, kind: input, shape index: {}]   ;;  %s4132_s4 = inlined_call_operand.vmem [shape: f32[1,128], index: 4, kind: input, shape index: {}]   ;;  %s4133_s5 = inlined_call_operand.hbm [shape: f32[2,8,8,128], index: 5, kind: output, shape index: {}]  }
   0x1   :  { %12 = vsyncpa [#allocation4 + $0x1], 0  ;;  %s3316_s18 = smov 0   ;;  %s3318_s19 = smov 0  }
   0x2   :  { %s3320_s20 = smov 0   ;;  %s3322_s21 = smov 0  }
   0x3 LB: > { %s3337_s22 = sadd.s32 4294967295, %s3277_s21   ;;  %s2381_s23 = sadd.s32 4294967294, %s3277_s21   ;;  %s3277_s21 = sphi %s3322_s21, %s4139_s21   ;;  %s3273_s20 = sphi %s3320_s20, %s4138_s20   ;;  %s3269_s19 = sphi %s3318_s19, %s4137_s19   ;;  %s3265_s18 = sphi %s3316_s18, %s4136_s18  }
   0x4   : > { %s3341_s24 = sadd.s32 1, %s3277_s21   ;;  %s135_s25 = sadd.s32 1, %s3273_s20 }
   0x5   : > { %s132_s26 = ssub.s32 %s3277_s21, %s3341_s24  ;;  %p145_p0 = scmp.ne.s32.totalorder %s3273_s20, %s3269_s19 }
   0x6   : > { %p133_p1 = scmp.eq.s32.totalorder %s132_s26, 0  ;;  %p146_p2 = scmp.eq.s32.totalorder %s3337_s22, 1 }
   0x7   : > { %p151_p3 = scmp.ne.s32.totalorder %s3269_s19, %s3265_s18  ;;  %p152_p4 = scmp.eq.s32.totalorder %s2381_s23, 1 }
   0x8   : > { %s3352_s27 = scalar_select %p133_p1, %s3273_s20, %s135_s25  }
   0x9   : > { %p3354_p5 = por %p146_p2, %p145_p0  ;;  %p3358_p6 = por %p152_p4, %p151_p3 }
   0xa   : > { %p2384_p7 = scmp.ge.s32.totalorder %s3277_s21, 1  ;;  %p190_p8 = scmp.lt.s32.totalorder %s3277_s21, 3 }
   0xc   : > { %p191_p9 = pnand %p2384_p7, %p190_p8 }
   0xd   : > { %p218_p10 = scmp.lt.s32.totalorder (!%p191_p9), %s3337_s22, 1  ;;  %s3280_s16 = smov (!%p191_p9), 64  }
   0xe   : > { %194 = sbr.rel (%p191_p9) target bundleno = 1338 (0x53a), region = 40  ;;  %s3282_s10 = smov (!%p191_p9), 96  }
   0xf   : > { %s215_s26 = sand.u32 (!%p191_p9), 1, %s3269_s19   ;;  %s2544_s9 = sshll.u32 (!%p191_p9), %s3337_s22, 10 }
  0x10   : > { %s2385_s30 = sshll.u32 (!%p191_p9), %s215_s26, 6  ;;  %s4082_s14 = scalar_lea.hbm (!%p191_p9), %s4133_s5, %s2544_s9 }
  0x11   : > { %s217_s8 = scalar_lea.vmem (!%p191_p9), [#allocation3], %s2385_s30 }
  0x12   : > { %s2319_s11 = sshll.u32 (!%p191_p9), %s217_s8, 4  ;;  %s4084_s11 = int_to_ptr.vmem [resolvable:$true] %s2319_s11 }
  0x13   : > { %vm224_vm0 = vcmask 261120   ;;  %vm226_vm1 = vcmask 254976   ;;  %v3161_v0 = vld [vmem:[%s4129_s1 + $0x78] sm:$0xff]   ;;  %v3279_v1 = vmov 0.0   ;;  %s219_s7 = scalar_select %p218_p10, %s3337_s22, 1  ;;  %v3163_v3 = vld [vmem:[%s4129_s1 + $0x70] sm:$0xff]  }
  0x14   : > { %230 = vst.msk [vmem:[#allocation2 + $0x20] sm:$0xff] %vm224_vm0, %v3279_v1  ;;  %232 = vst.msk [vmem:[#allocation2 + $0x30] sm:$0xff] %vm224_vm0, %v3279_v1  ;;  %2564 = vmatprep.subr.bf16.mxu0 %v3161_v0  ;;  %v3162_v2 = vld [vmem:[%s4129_s1 + $0x38] sm:$0xff]   ;;  %v3164_v4 = vld [vmem:[%s4129_s1 + $0x30] sm:$0xff]   ;;  %vm544_vm2 = vcmask 523264   ;;  %vm553_vm3 = vcmask 785408  }
  0x15   : > { %231 = vst.msk [vmem:[#allocation2 + $0x28] sm:$0x3] %vm226_vm1, %v3279_v1  ;;  %233 = vst.msk [vmem:[#allocation2 + $0x38] sm:$0x3] %vm226_vm1, %v3279_v1  ;;  %s2543_s12 = sshll.u32 %s219_s7, 5  ;;  %2565 = vmatpush3.bf16.msra.mxu0 %v3162_v2  ;;  %v3165_v5 = vld [vmem:[%s4129_s1 + $0x68] sm:$0xff]  }
  0x16   : > { %225 = vst.msk [vmem:[#allocation2] sm:$0xff] %vm224_vm0, %v3279_v1  ;;  %228 = vst.msk [vmem:[#allocation2 + $0x10] sm:$0xff] %vm224_vm0, %v3279_v1  ;;  %s222_s17 = scalar_lea.vmem %s4128_s0, %s2543_s12  ;;  %2566 = vmatprep.subr.bf16.mxu0 %v3163_v3  ;;  %v3166_v18 = vld [vmem:[%s4129_s1 + $0x28] sm:$0xff]   ;;  %v3167_v19 = vld [vmem:[%s4129_s1 + $0x60] sm:$0xff]   ;;  %s4088_s22 = scalar_lea.sflag [#allocation4], %s215_s26 }
  0x17   : > { %227 = vst.msk [vmem:[#allocation2 + $0x8] sm:$0x3] %vm226_vm1, %v3279_v1  ;;  %229 = vst.msk [vmem:[#allocation2 + $0x18] sm:$0x3] %vm226_vm1, %v3279_v1  ;;  %v2546_v6 = vld [vmem:[%s222_s17] sm:$0xff]   ;;  %v2561_v7 = vld [vmem:[%s222_s17 + $0x8] sm:$0xff]  }
  0x18   : > { %234 = vst.msk [vmem:[#allocation2 + $0x40] sm:$0xff] %vm224_vm0, %v3279_v1  ;;  %236 = vst.msk [vmem:[#allocation2 + $0x50] sm:$0xff] %vm224_vm0, %v3279_v1  ;;  %v2562_v8 = vld [vmem:[%s222_s17 + $0x10] sm:$0xff]   ;;  %v2548_v9 = vunpack.c.h.bf16 %v2546_v6  ;;  %v2551_v10 = vunpack.c.l.bf16 %v2561_v7  ;;  %v2552_v11 = vunpack.c.h.bf16 %v2561_v7  ;;  %v2547_v12 = vunpack.c.l.bf16 %v2546_v6  ;;  %v2563_v13 = vld [vmem:[%s222_s17 + $0x18] sm:$0xff]   ;;  %s3281_s17 = smov 32  }
  0x19   : > { %235 = vst.msk [vmem:[#allocation2 + $0x48] sm:$0x3] %vm226_vm1, %v3279_v1  ;;  %237 = vst.msk [vmem:[#allocation2 + $0x58] sm:$0x3] %vm226_vm1, %v3279_v1  ;;  %v2555_v14 = vunpack.c.l.bf16 %v2562_v8  ;;  %v2556_v15 = vunpack.c.h.bf16 %v2562_v8  ;;  %v2559_v16 = vunpack.c.l.bf16 %v2563_v13  ;;  %v2560_v17 = vunpack.c.h.bf16 %v2563_v13  ;;  %2567 = vmatpush3.bf16.msra.mxu0 %v3164_v4  ;;  %v3168_v20 = vld [vmem:[%s4129_s1 + $0x20] sm:$0xff]   ;;  %v3169_v21 = vld [vmem:[%s4129_s1 + $0x58] sm:$0xff]  }
  0x1a   : > { %238 = vst.msk [vmem:[#allocation2 + $0x60] sm:$0xff] %vm224_vm0, %v3279_v1  ;;  %240 = vst.msk [vmem:[#allocation2 + $0x70] sm:$0xff] %vm224_vm0, %v3279_v1  ;;  %2568 = vmatprep.subr.bf16.mxu0 %v3165_v5  ;;  %v3170_v24 = vld [vmem:[%s4129_s1 + $0x18] sm:$0xff]   ;;  %v3171_v31 = vld [vmem:[%s4129_s1 + $0x50] sm:$0xff]  }
  0x1b   : > { %239 = vst.msk [vmem:[#allocation2 + $0x68] sm:$0x3] %vm226_vm1, %v3279_v1  ;;  %241 = vst.msk [vmem:[#allocation2 + $0x78] sm:$0x3] %vm226_vm1, %v3279_v1  ;;  %v3172_v39 = vld [vmem:[%s4129_s1 + $0x10] sm:$0xff]   ;;  %v3173_v44 = vld [vmem:[%s4129_s1 + $0x48] sm:$0xff]  }
  0x1c   : > { %242 = vst.msk [vmem:[#allocation2 + $0x80] sm:$0xff] %vm224_vm0, %v3279_v1  ;;  %244 = vst.msk [vmem:[#allocation2 + $0x90] sm:$0xff] %vm224_vm0, %v3279_v1  ;;  %v3174_v45 = vld [vmem:[%s4129_s1 + $0x8] sm:$0xff]   ;;  %v3176_v49 = vld [vmem:[%s4129_s1 + $0x40] sm:$0xff]  }
  0x1d   : > { %243 = vst.msk [vmem:[#allocation2 + $0x88] sm:$0x3] %vm226_vm1, %v3279_v1  ;;  %245 = vst.msk [vmem:[#allocation2 + $0x98] sm:$0x3] %vm226_vm1, %v3279_v1  ;;  %2569 = vmatpush3.bf16.msra.mxu0 %v3166_v18  ;;  %v3175_v46 = vld [vmem:[%s4129_s1 + $0x88] sm:$0xff]   ;;  %v3177_v51 = vld [vmem:[%s4129_s1] sm:$0xff]  }
  0x1e   : > { %264 = vst.msk [vmem:[#allocation2 + $0x21] sm:$0xff] %vm224_vm0, %v2548_v9  ;;  %265 = vst.msk [vmem:[#allocation2 + $0x31] sm:$0xff] %vm224_vm0, %v2551_v10  ;;  %2570 = vmatprep.subr.bf16.mxu0 %v3167_v19  ;;  %v3426_v22 = vld [vmem:[#allocation2 + $0x2] sm:$0xff]  ;;  %2708 = vmatprep.subr.bf16.mxu1 %v3175_v46 }
  0x1f   : > { %263 = vst.msk [vmem:[#allocation2 + $0x11] sm:$0xff] %vm224_vm0, %v2547_v12  ;;  %266 = vst.msk [vmem:[#allocation2 + $0x41] sm:$0xff] %vm224_vm0, %v2552_v11  ;;  %v3428_v23 = vld [vmem:[#allocation2 + $0x1] sm:$0xff]  ;;  %2709 = vmatpush3.bf16.msra.mxu1 %v3175_v46 }
  0x20   : > { %267 = vst.msk [vmem:[#allocation2 + $0x51] sm:$0xff] %vm224_vm0, %v2555_v14  ;;  %268 = vst.msk [vmem:[#allocation2 + $0x61] sm:$0xff] %vm224_vm0, %v2556_v15  ;;  %v3178_v53 = vld [vmem:[%s4129_s1 + $0x80] sm:$0xff]  }
  0x21   : > { %269 = vst.msk [vmem:[#allocation2 + $0x71] sm:$0xff] %vm224_vm0, %v2559_v16  ;;  %270 = vst.msk [vmem:[#allocation2 + $0x81] sm:$0xff] %vm224_vm0, %v2560_v17  ;;  %2571 = vmatpush3.bf16.msra.mxu0 %v3168_v20  ;;  %2710 = vmatprep.subr.bf16.mxu1 %v3178_v53 }
  0x22   : > { %2572 = vmatprep.subr.bf16.mxu0 %v3169_v21 }
  0x23   : > { %2711 = vmatpush3.bf16.msra.mxu1 %v3178_v53  ;;  %v3530_v13 = vld [vmem:[#allocation2 + $0x90] sm:$0xff] }
  0x24   : > { %v3510_v4 = vld [vmem:[#allocation2 + $0x92] sm:$0xff] }
  0x25   : > { %v3433_v25 = vld [vmem:[#allocation2 + $0x20] sm:$0xff]  ;;  %v3435_v26 = vld [vmem:[#allocation2 + $0x30] sm:$0xff]  ;;  %2573 = vmatpush3.bf16.msra.mxu0 %v3170_v24 }
  0x26   : > { %v311_v27 = vld [vmem:[#allocation2 + $0x12] sm:$0xff]  ;;  %v2811_v28 = vpack.i.bf16 %v3435_v26, %v3433_v25  ;;  %v312_v29 = vld [vmem:[#allocation2 + $0x22] sm:$0xff]  ;;  %2574 = vmatprep.subr.bf16.mxu0 %v3171_v31 }
  0x27   : > { %v3439_v30 = vld [vmem:[#allocation2 + $0x11] sm:$0xff]  ;;  %v2801_v32 = vpack.i.bf16 %v312_v29, %v311_v27  ;;  %v2816_v33 = vpack.i.bf16 %v311_v27, %v3426_v22  ;;  %v3451_v37 = vld [vmem:[#allocation2 + $0x21] sm:$0xff] }
  0x28   : > { %2812 = vrot.lane.b32.xlu1 %v2811_v28, %s3280_s16  ;;  %v2806_v34 = vpack.i.bf16 %v3439_v30, %v3428_v23  ;;  %v3449_v35 = vld [vmem:[#allocation2 + $0x10] sm:$0xff]  ;;  %v314_v42 = vld [vmem:[#allocation2 + $0x42] sm:$0xff] }
  0x29   : > { %2802 = vrot.lane.b32.xlu0 %v2801_v32, %s3281_s17  ;;  %v313_v36 = vld [vmem:[#allocation2 + $0x32] sm:$0xff]  ;;  %v2826_v41 = vpack.i.bf16 %v3433_v25, %v3449_v35  ;;  %2575 = vmatpush3.bf16.msra.mxu0 %v3172_v39  ;;  %v3475_v47 = vld [vmem:[#allocation2 + $0x40] sm:$0xff] }
  0x2a   : > { %v3453_v38 = vld [vmem:[#allocation2 + $0x31] sm:$0xff]  ;;  %v588_v40 = vpack.c.bf16 %v313_v36, %v312_v29  ;;  %2576 = vmatprep.subr.bf16.mxu0 %v3173_v44  ;;  %v2831_v50 = vpack.i.bf16 %v314_v42, %v313_v36  ;;  %v2846_v54 = vpack.i.bf16 %v313_v36, %v312_v29  ;;  %v3490_v55 = vld [vmem:[#allocation2 + $0x41] sm:$0xff]  ;;  %v2856_v59 = vpack.i.bf16 %v3475_v47, %v3435_v26 }
  0x2b   : > { %v2821_v43 = vpack.i.bf16 %v3453_v38, %v3451_v37  ;;  %v3477_v48 = vld [vmem:[#allocation2 + $0x50] sm:$0xff]  ;;  %v316_v60 = vld [vmem:[#allocation2 + $0x62] sm:$0xff] }
  0x2c   : > { %2817 = vrot.lane.b32.xlu1 %v2816_v33, %s3280_s16  ;;  %2712 = vmatprep.mubr.msk.bf16.mxu1 %vm224_vm0, %v588_v40  ;;  %v315_v52 = vld [vmem:[#allocation2 + $0x52] sm:$0xff]  ;;  %v2841_v57 = vpack.i.bf16 %v3477_v48, %v3475_v47  ;;  %v318_v63 = vld [vmem:[#allocation2 + $0x82] sm:$0xff] }
  0x2d   : > { %2807 = vrot.lane.b32.xlu0 %v2806_v34, %s3281_s17  ;;  %2577 = vmatpush3.bf16.msra.mxu0 %v3174_v45  ;;  %v3492_v56 = vld [vmem:[#allocation2 + $0x51] sm:$0xff]  ;;  %v591_v58 = vpack.c.bf16 %v315_v52, %v314_v42  ;;  %v3505_v0 = vld [vmem:[#allocation2 + $0x60] sm:$0xff]  ;;  %v2861_v3 = vpack.i.bf16 %v316_v60, %v315_v52  ;;  %v597_v5 = vpack.c.bf16 %v3510_v4, %v318_v63 }
  0x2e   : > { %2578 = vmatprep.subr.bf16.mxu0 %v3176_v49  ;;  %v2851_v61 = vpack.i.bf16 %v3492_v56, %v3490_v55  ;;  %v317_v62 = vld [vmem:[#allocation2 + $0x72] sm:$0xff]  ;;  %v2876_v6 = vpack.i.bf16 %v315_v52, %v314_v42  ;;  %v3515_v7 = vld [vmem:[#allocation2 + $0x61] sm:$0xff]  ;;  %v2886_v10 = vpack.i.bf16 %v3505_v0, %v3477_v48 }
  0x2f   : > { %2713 = vmatmul.mubr.msk.bf16.vlgmr.msra.gmra.mxu1 %vm224_vm0, %v591_v58  ;;  %v3507_v1 = vld [vmem:[#allocation2 + $0x70] sm:$0xff]  ;;  %v594_v2 = vpack.c.bf16 %v317_v62, %v316_v60  ;;  %v326_v12 = vld [vmem:[#allocation2 + $0x80] sm:$0xff]  ;;  %v2891_v14 = vpack.i.bf16 %v318_v63, %v317_v62  ;;  %v2906_v15 = vpack.i.bf16 %v317_v62, %v316_v60 }
  0x30   : > { %2827 = vrot.lane.b32.xlu1 %v2826_v41, %s3282_s10  ;;  %v3517_v8 = vld [vmem:[#allocation2 + $0x71] sm:$0xff]  ;;  %v2871_v9 = vpack.i.bf16 %v3507_v1, %v3505_v0  ;;  %v2901_v16 = vpack.i.bf16 %v3530_v13, %v326_v12  ;;  %v3536_v17 = vld [vmem:[#allocation2 + $0x81] sm:$0xff]  ;;  %v2916_v19 = vpack.i.bf16 %v326_v12, %v3507_v1 }
  0x31   : > { %2822 = vrot.lane.b32.xlu0 %v2821_v43, %s3282_s10  ;;  %2579 = vmatpush3.bf16.msra.mxu0 %v3177_v51  ;;  %v2881_v11 = vpack.i.bf16 %v3517_v8, %v3515_v7  ;;  %v3538_v18 = vld [vmem:[#allocation2 + $0x91] sm:$0xff]  ;;  %v3547_v31 = vld [vmem:[#allocation2] sm:$0xff] }
  0x32   : > { %2716 = vmatprep.mubr.msk.bf16.mxu1 %vm224_vm0, %v594_v2  ;;  %v2911_v20 = vpack.i.bf16 %v3538_v18, %v3536_v17 }
  0x34   : > { %2837 = vrot.lane.b32.xlu1 %v2821_v43, %s3281_s17 }
  0x35   : > { %2832 = vrot.lane.b32.xlu0 %v2831_v50, %s3281_s17 }
  0x37   : > { %2717 = vmatmul.mubr.msk.bf16.gmra.mxu1 %vm224_vm0, %v597_v5 }
  0x38   : > { %2847 = vrot.lane.b32.xlu1 %v2846_v54, %s3280_s16 }
  0x39   : > { %2842 = vrot.lane.b32.xlu0 %v2841_v57, %s3280_s16 }
  0x3c   : > { %2857 = vrot.lane.b32.xlu1 %v2856_v59, %s3282_s10 }
  0x3d   : > { %2852 = vrot.lane.b32.xlu0 %v2851_v61, %s3282_s10 }
  0x40   : > { %2867 = vrot.lane.b32.xlu1 %v2851_v61, %s3281_s17 }
  0x41   : > { %2862 = vrot.lane.b32.xlu0 %v2861_v3, %s3281_s17 }
  0x44   : > { %2877 = vrot.lane.b32.xlu1 %v2876_v6, %s3280_s16 }
  0x45   : > { %2872 = vrot.lane.b32.xlu0 %v2871_v9, %s3280_s16 }
  0x48   : > { %2887 = vrot.lane.b32.xlu1 %v2886_v10, %s3282_s10 }
  0x49   : > { %2882 = vrot.lane.b32.xlu0 %v2881_v11, %s3282_s10 }
  0x4c   : > { %2897 = vrot.lane.b32.xlu1 %v2881_v11, %s3281_s17 }
  0x4d   : > { %2892 = vrot.lane.b32.xlu0 %v2891_v14, %s3281_s17 }
  0x50   : > { %2907 = vrot.lane.b32.xlu1 %v2906_v15, %s3280_s16 }
  0x51   : > { %2902 = vrot.lane.b32.xlu0 %v2901_v16, %s3280_s16 }
  0x54   : > { %2917 = vrot.lane.b32.xlu1 %v2916_v19, %s3282_s10 }
  0x55   : > { %2912 = vrot.lane.b32.xlu0 %v2911_v20, %s3282_s10 }
  0x9a   : > { %v2813_v21 = vpop.permute.xlu1 %2812 }
  0x9b   : > { %v2803_v24 = vpop.permute.xlu0 %2802  ;;  %v2815_v40 = vunpack.i.h.bf16 %v2813_v21  ;;  %v2814_v41 = vunpack.i.l.bf16 %v2813_v21 }
  0x9c   : > { %v2805_v27 = vunpack.i.h.bf16 %v2803_v24  ;;  %v2804_v28 = vunpack.i.l.bf16 %v2803_v24 }
  0x9e   : > { %v2818_v29 = vpop.permute.xlu1 %2817  ;;  %v562_v45 = vsel %vm224_vm0, %v3439_v30, %v2804_v28  ;;  %v563_v46 = vsel %vm224_vm0, %v3451_v37, %v2805_v27 }
  0x9f   : > { %v2808_v32 = vpop.permute.xlu0 %2807  ;;  %v2820_v33 = vunpack.i.h.bf16 %v2818_v29  ;;  %v2819_v34 = vunpack.i.l.bf16 %v2818_v29  ;;  %v570_v58 = vsel %vm544_vm2, %v562_v45, %v2814_v41 }
  0xa0   : > { %v2810_v36 = vunpack.i.h.bf16 %v2808_v32  ;;  %v2809_v39 = vunpack.i.l.bf16 %v2808_v32 }
  0xa2   : > { %v536_v42 = vsel %vm224_vm0, %v3547_v31, %v2809_v39  ;;  %v537_v43 = vsel %vm224_vm0, %v3449_v35, %v2810_v36  ;;  %v2828_v44 = vpop.permute.xlu1 %2827  ;;  %v571_v35 = vsel %vm544_vm2, %v563_v46, %v2815_v40 }
  0xa3   : > { %v2830_v49 = vunpack.i.h.bf16 %v2828_v44  ;;  %v2829_v50 = vunpack.i.l.bf16 %v2828_v44  ;;  %v2823_v51 = vpop.permute.xlu0 %2822  ;;  %v545_v54 = vsel %vm544_vm2, %v536_v42, %v2819_v34  ;;  %v546_v57 = vsel %vm544_vm2, %v537_v43, %v2820_v33 }
  0xa4   : > { %v2825_v52 = vunpack.i.h.bf16 %v2823_v51  ;;  %v2824_v53 = vunpack.i.l.bf16 %v2823_v51 }
  0xa5   : > { %v554_v59 = vsel %vm553_vm3, %v545_v54, %v2829_v50  ;;  %v555_v30 = vsel %vm553_vm3, %v546_v57, %v2830_v49 }
  0xa6   : > { %v2838_v60 = vpop.permute.xlu1 %2837  ;;  %v578_v37 = vsel %vm553_vm3, %v570_v58, %v2824_v53  ;;  %v579_v61 = vsel %vm553_vm3, %v571_v35, %v2825_v52  ;;  %v586_v62 = vpack.c.bf16 %v555_v30, %v554_v59 }
  0xa7   : > { %v2833_v63 = vpop.permute.xlu0 %2832  ;;  %v587_v2 = vpack.c.bf16 %v579_v61, %v578_v37  ;;  %v2840_v3 = vunpack.i.h.bf16 %v2838_v60  ;;  %v2839_v5 = vunpack.i.l.bf16 %v2838_v60 }
  0xa8   : > { %v2835_v9 = vunpack.i.h.bf16 %v2833_v63  ;;  %v2834_v10 = vunpack.i.l.bf16 %v2833_v63 }
  0xa9   : > { %793 = vmatprep.mubr.bf16.mxu0 %v587_v2  ;;  %v539_v19 = vsel %vm224_vm0, %v3435_v26, %v2840_v3  ;;  %v538_v20 = vsel %vm224_vm0, %v3433_v25, %v2839_v5 }
  0xaa   : > { %794 = vmatmul.mubr.bf16.vlgmr.msra.gmra.mxu0 %v586_v62  ;;  %v2848_v6 = vpop.permute.xlu1 %2847  ;;  %v565_v24 = vsel %vm224_vm0, %v3490_v55, %v2835_v9  ;;  %v564_v27 = vsel %vm224_vm0, %v3453_v38, %v2834_v10 }
  0xab   : > { %v2843_v11 = vpop.permute.xlu0 %2842  ;;  %v2850_v12 = vunpack.i.h.bf16 %v2848_v6  ;;  %v2849_v14 = vunpack.i.l.bf16 %v2848_v6 }
  0xac   : > { %v2845_v15 = vunpack.i.h.bf16 %v2843_v11  ;;  %v2844_v16 = vunpack.i.l.bf16 %v2843_v11 }
  0xad   : > { %v547_v33 = vsel %vm544_vm2, %v538_v20, %v2849_v14  ;;  %v548_v34 = vsel %vm544_vm2, %v539_v19, %v2850_v12 }
  0xae   : > { %v2858_v21 = vpop.permute.xlu1 %2857  ;;  %v572_v26 = vsel %vm544_vm2, %v564_v27, %v2844_v16  ;;  %v573_v25 = vsel %vm544_vm2, %v565_v24, %v2845_v15 }
  0xaf   : > { %v2860_v28 = vunpack.i.h.bf16 %v2858_v21  ;;  %v2859_v29 = vunpack.i.l.bf16 %v2858_v21  ;;  %v2853_v32 = vpop.permute.xlu0 %2852 }
  0xb0   : > { %v2855_v36 = vunpack.i.h.bf16 %v2853_v32  ;;  %v2854_v39 = vunpack.i.l.bf16 %v2853_v32 }
  0xb1   : > { %v556_v40 = vsel %vm553_vm3, %v547_v33, %v2859_v29  ;;  %v557_v55 = vsel %vm553_vm3, %v548_v34, %v2860_v28 }
  0xb2   : > { %v2868_v41 = vpop.permute.xlu1 %2867  ;;  %v580_v38 = vsel %vm553_vm3, %v572_v26, %v2854_v39  ;;  %v581_v42 = vsel %vm553_vm3, %v573_v25, %v2855_v36  ;;  %v589_v43 = vpack.c.bf16 %v557_v55, %v556_v40 }
  0xb3   : > { %v2863_v44 = vpop.permute.xlu0 %2862  ;;  %v590_v45 = vpack.c.bf16 %v581_v42, %v580_v38  ;;  %v2870_v46 = vunpack.i.h.bf16 %v2868_v41  ;;  %v2869_v49 = vunpack.i.l.bf16 %v2868_v41 }
  0xb4   : > { %v2865_v51 = vunpack.i.h.bf16 %v2863_v44  ;;  %v2864_v52 = vunpack.i.l.bf16 %v2863_v44 }
  0xb5   : > { %801 = vmatprep.mubr.bf16.mxu0 %v590_v45  ;;  %v541_v59 = vsel %vm224_vm0, %v3477_v48, %v2870_v46  ;;  %v540_v30 = vsel %vm224_vm0, %v3475_v47, %v2869_v49 }
  0xb6   : > { %802 = vmatmul.mubr.bf16.gmra.mxu0 %v589_v43  ;;  %v2878_v50 = vpop.permute.xlu1 %2877  ;;  %v567_v37 = vsel %vm224_vm0, %v3515_v7, %v2865_v51  ;;  %v566_v61 = vsel %vm224_vm0, %v3492_v56, %v2864_v52  ;;  %v3179_v52 = vld [vmem:[%s4129_s1 + $0x118] sm:$0xff]  }
  0xb7   : > { %v2873_v53 = vpop.permute.xlu0 %2872  ;;  %v2880_v54 = vunpack.i.h.bf16 %v2878_v50  ;;  %v2879_v57 = vunpack.i.l.bf16 %v2878_v50  ;;  %2720 = vmatprep.subr.bf16.mxu0 %v3179_v52 }
  0xb8   : > { %v2875_v58 = vunpack.i.h.bf16 %v2873_v53  ;;  %v2874_v35 = vunpack.i.l.bf16 %v2873_v53  ;;  %2721 = vmatpush3.bf16.msra.mxu0 %v3179_v52  ;;  %v3180_v53 = vld [vmem:[%s4129_s1 + $0x110] sm:$0xff]  }
  0xb9   : > { %v549_v3 = vsel %vm544_vm2, %v540_v30, %v2879_v57  ;;  %v550_v5 = vsel %vm544_vm2, %v541_v59, %v2880_v54  ;;  %2722 = vmatprep.subr.bf16.mxu0 %v3180_v53  ;;  %v3181_v54 = vld [vmem:[%s4129_s1 + $0x108] sm:$0xff]   ;;  %v3185_v59 = vld [vmem:[%s4129_s1 + $0xf8] sm:$0xff]  }
  0xba   : > { %v2888_v60 = vpop.permute.xlu1 %2887  ;;  %v574_v48 = vsel %vm544_vm2, %v566_v61, %v2874_v35  ;;  %v575_v47 = vsel %vm544_vm2, %v567_v37, %v2875_v58  ;;  %v3182_v57 = vld [vmem:[%s4129_s1 + $0xc8] sm:$0xff]   ;;  %v3183_v58 = vld [vmem:[%s4129_s1 + $0x100] sm:$0xff]   ;;  %2610 = vmatprep.subr.bf16.mxu1 %v3181_v54  ;;  %v3186_v30 = vld [vmem:[%s4129_s1 + $0xb8] sm:$0xff]  }
  0xbb   : > { %v2890_v62 = vunpack.i.h.bf16 %v2888_v60  ;;  %v2889_v63 = vunpack.i.l.bf16 %v2888_v60  ;;  %v2883_v2 = vpop.permute.xlu0 %2882  ;;  %2611 = vmatpush3.bf16.msra.mxu1 %v3182_v57  ;;  %v3184_v35 = vld [vmem:[%s4129_s1 + $0xc0] sm:$0xff]   ;;  %v3195_v54 = vld [vmem:[%s4129_s1 + $0xd0] sm:$0xff]  }
  0xbc   : > { %v2885_v6 = vunpack.i.h.bf16 %v2883_v2  ;;  %v2884_v9 = vunpack.i.l.bf16 %v2883_v2  ;;  %2723 = vmatpush3.bf16.msra.mxu0 %v3180_v53  ;;  %2612 = vmatprep.subr.bf16.mxu1 %v3183_v58  ;;  %v3196_v58 = vld [vmem:[%s4129_s1 + $0x90] sm:$0xff]  }
  0xbd   : > { %v558_v10 = vsel %vm553_vm3, %v549_v3, %v2889_v63  ;;  %v559_v7 = vsel %vm553_vm3, %v550_v5, %v2890_v62  ;;  %v3640_v62 = vld [vmem:[%s4130_s2] ss:$0 sm:$0xff] }
  0xbe   : > { %v2898_v11 = vpop.permute.xlu1 %2897  ;;  %v582_v56 = vsel %vm553_vm3, %v574_v48, %v2884_v9  ;;  %v583_v12 = vsel %vm553_vm3, %v575_v47, %v2885_v6  ;;  %v592_v14 = vpack.c.bf16 %v559_v7, %v558_v10 }
  0xbf   : > { %v2893_v15 = vpop.permute.xlu0 %2892  ;;  %v593_v16 = vpack.c.bf16 %v583_v12, %v582_v56  ;;  %v2900_v19 = vunpack.i.h.bf16 %v2898_v11  ;;  %v2899_v20 = vunpack.i.l.bf16 %v2898_v11  ;;  %2613 = vmatpush3.bf16.msra.mxu1 %v3184_v35 }
  0xc0   : > { %v2895_v24 = vunpack.i.h.bf16 %v2893_v15  ;;  %v2894_v27 = vunpack.i.l.bf16 %v2893_v15  ;;  %2614 = vmatprep.subr.bf16.mxu1 %v3185_v59 }
  0xc1   : > { %809 = vmatprep.mubr.bf16.mxu0 %v593_v16  ;;  %v543_v36 = vsel %vm224_vm0, %v3507_v1, %v2900_v19  ;;  %v542_v39 = vsel %vm224_vm0, %v3505_v0, %v2899_v20  ;;  %v3188_v16 = vld [vmem:[%s4129_s1 + $0xb0] sm:$0xff]  }
  0xc2   : > { %810 = vmatmul.mubr.bf16.gmra.mxu0 %v592_v14  ;;  %v2908_v21 = vpop.permute.xlu1 %2907  ;;  %v569_v25 = vsel %vm224_vm0, %v3536_v17, %v2895_v24  ;;  %v568_v40 = vsel %vm224_vm0, %v3517_v8, %v2894_v27  ;;  %v3187_v14 = vld [vmem:[%s4129_s1 + $0xf0] sm:$0xff]   ;;  %v3189_v27 = vld [vmem:[%s4129_s1 + $0xe8] sm:$0xff]  }
  0xc3   : > { %v2903_v28 = vpop.permute.xlu0 %2902  ;;  %v2910_v29 = vunpack.i.h.bf16 %v2908_v21  ;;  %v2909_v32 = vunpack.i.l.bf16 %v2908_v21  ;;  %2615 = vmatpush3.bf16.msra.mxu1 %v3186_v30 }
  0xc4   : > { %v2905_v33 = vunpack.i.h.bf16 %v2903_v28  ;;  %v2904_v34 = vunpack.i.l.bf16 %v2903_v28  ;;  %2616 = vmatprep.subr.bf16.mxu1 %v3187_v14 }
  0xc5   : > { %v551_v42 = vsel %vm544_vm2, %v542_v39, %v2909_v32  ;;  %v552_v43 = vsel %vm544_vm2, %v543_v36, %v2910_v29  ;;  %v3190_v29 = vld [vmem:[%s4129_s1 + $0xa8] sm:$0xff]   ;;  %v3191_v39 = vld [vmem:[%s4129_s1 + $0xe0] sm:$0xff]  }
  0xc6   : > { %v2918_v26 = vpop.permute.xlu1 %2917  ;;  %v576_v1 = vsel %vm544_vm2, %v568_v40, %v2904_v34  ;;  %v577_v0 = vsel %vm544_vm2, %v569_v25, %v2905_v33 }
  0xc7   : > { %v2920_v55 = vunpack.i.h.bf16 %v2918_v26  ;;  %v2919_v41 = vunpack.i.l.bf16 %v2918_v26  ;;  %v2913_v38 = vpop.permute.xlu0 %2912  ;;  %2617 = vmatpush3.bf16.msra.mxu1 %v3188_v16 }
  0xc8   : > { %v2915_v44 = vunpack.i.h.bf16 %v2913_v38  ;;  %v2914_v45 = vunpack.i.l.bf16 %v2913_v38  ;;  %2618 = vmatprep.subr.bf16.mxu1 %v3189_v27 }
  0xc9   : > { %v560_v46 = vsel %vm553_vm3, %v551_v42, %v2919_v41  ;;  %v561_v17 = vsel %vm553_vm3, %v552_v43, %v2920_v55  ;;  %v3192_v41 = vld [vmem:[%s4129_s1 + $0xa0] sm:$0xff]  }
  0xca   : > { %v584_v49 = vsel %vm553_vm3, %v576_v1, %v2914_v45  ;;  %v585_v8 = vsel %vm553_vm3, %v577_v0, %v2915_v44  ;;  %v595_v50 = vpack.c.bf16 %v561_v17, %v560_v46  ;;  %v3193_v45 = vld [vmem:[%s4129_s1 + $0xd8] sm:$0xff]  }
  0xcb   : > { %v596_v51 = vpack.c.bf16 %v585_v8, %v584_v49  ;;  %2619 = vmatpush3.bf16.msra.mxu1 %v3190_v29  ;;  %v3194_v49 = vld [vmem:[%s4129_s1 + $0x98] sm:$0xff]  }
  0xcc   : > { %2620 = vmatprep.subr.bf16.mxu1 %v3191_v39 }
  0xcd   : > { %817 = vmatprep.mubr.bf16.mxu0 %v596_v51 }
  0xce   : > { %818 = vmatmul.mubr.bf16.gmra.mxu0 %v595_v50 }
  0xcf   : > { %2621 = vmatpush3.bf16.msra.mxu1 %v3192_v41 }
  0xd0   : > { %2622 = vmatprep.subr.bf16.mxu1 %v3193_v45 }
  0xd3   : > { %2623 = vmatpush3.bf16.msra.mxu1 %v3194_v49 }
  0xd4   : > { %2624 = vmatprep.subr.bf16.mxu1 %v3195_v54 }
  0xd7   : > { %2625 = vmatpush3.bf16.msra.mxu1 %v3196_v58 }
  0xef   : > { %v2714_v60 = vpop.f32.mrf.mxu1 }
  0xf1   : > { %v860_v63 = vpop.f32.mrf.mxu1 }
  0xf3   : > { %v2715_v9 = vpop.f32.mrf.mxu1 }
  0xf5   : > { %v863_v11 = vpop.f32.mrf.mxu1 }
  0xf7   : > { %v3670_v38 = vpop.f32.mrf.mxu1 }
  0xf9   : > { %v876_v8 = vpop.f32.mrf.mxu1 }
  0xfb   : > { %v2719_v30 = vpop.f32.mrf.mxu1 }
 0x16a   : > { %v2580_v37 = vpop.f32.mrf.mxu0 }
 0x16c   : > { %v2581_v61 = vpop.f32.mrf.mxu0 }
 0x16d   : > { %v2582_v2 = vadd.f32 %v2581_v61, %v2580_v37 }
 0x16e   : > { %v2583_v3 = vpop.f32.mrf.mxu0 }
 0x16f   : > { %v796_v5 = vadd.f32 %v2582_v2, %v3640_v62 }
 0x170   : > { %v2584_v6 = vpop.f32.mrf.mxu0 }
 0x171   : > { %v861_v48 = vadd.f32 %v860_v63, %v796_v5  ;;  %v2585_v47 = vadd.f32 %v2584_v6, %v2583_v3 }
 0x173   : > { %v891_v10 = vmul.f32 0.1, %v861_v48  ;;  %v799_v7 = vadd.f32 %v2585_v47, %v3640_v62 }
 0x175   : > { %v899_v56 = vmax.f32 %v861_v48, %v891_v10  ;;  %v864_v12 = vadd.f32 %v863_v11, %v799_v7  ;;  %v879_v10 = vpop.f32.mrf.mxu1 }
 0x176   : > { %v2586_v15 = vpop.f32.mrf.mxu0 }
 0x177   : > { %907 = vst.msk [vmem:[#allocation2 + $0x11] sm:$0xff] %vm224_vm0, %v899_v56  ;;  %v892_v19 = vmul.f32 0.1, %v864_v12 }
 0x178   : > { %v2587_v20 = vpop.f32.mrf.mxu0 }
 0x179   : > { %v900_v21 = vmax.f32 %v864_v12, %v892_v19  ;;  %v2588_v24 = vadd.f32 %v2587_v20, %v2586_v15 }
 0x17a   : > { %v2589_v28 = vpop.f32.mrf.mxu0 }
 0x17b   : > { %908 = vst.msk [vmem:[#allocation2 + $0x21] sm:$0xff] %vm224_vm0, %v900_v21  ;;  %v804_v32 = vadd.f32 %v2588_v24, %v3640_v62 }
 0x17c   : > { %v2590_v33 = vpop.f32.mrf.mxu0 }
 0x17d   : > { %v869_v34 = vadd.f32 %v2714_v60, %v804_v32  ;;  %v2591_v36 = vadd.f32 %v2590_v33, %v2589_v28 }
 0x17e   : > { %v3662_v26 = vld [vmem:[#allocation2 + $0x11] sm:$0xff] }
 0x17f   : > { %v893_v25 = vmul.f32 0.1, %v869_v34  ;;  %v807_v40 = vadd.f32 %v2591_v36, %v3640_v62  ;;  %v2921_v55 = vpack.i.bf16 %v3662_v26, %v3428_v23  ;;  %v955_v42 = vld [vmem:[#allocation2 + $0x12] sm:$0xff] }
 0x180   : > { %v2926_v17 = vpack.i.bf16 %v955_v42, %v3426_v22  ;;  %v3688_v57 = vld [vmem:[#allocation2 + $0x10] sm:$0xff] }
 0x181   : > { %v901_v43 = vmax.f32 %v869_v34, %v893_v25  ;;  %v872_v44 = vadd.f32 %v2715_v9, %v807_v40  ;;  %2922 = vrot.lane.b32.xlu1 %v2921_v55, %s3281_s17 }
 0x182   : > { %v2592_v1 = vpop.f32.mrf.mxu0  ;;  %v956_v0 = vld [vmem:[#allocation2 + $0x22] sm:$0xff] }
 0x183   : > { %909 = vst.msk [vmem:[#allocation2 + $0x31] sm:$0xff] %vm224_vm0, %v901_v43  ;;  %v894_v23 = vmul.f32 0.1, %v872_v44  ;;  %v2931_v46 = vpack.i.bf16 %v956_v0, %v955_v42  ;;  %v3681_v51 = vld [vmem:[#allocation2 + $0x20] sm:$0xff] }
 0x184   : > { %v2593_v50 = vpop.f32.mrf.mxu0  ;;  %v2936_v59 = vpack.i.bf16 %v3681_v51, %v3688_v57  ;;  %v3705_v47 = vld [vmem:[#allocation2 + $0x21] sm:$0xff] }
 0x185   : > { %v902_v52 = vmax.f32 %v872_v44, %v894_v23  ;;  %v2594_v53 = vadd.f32 %v2593_v50, %v2592_v1  ;;  %2932 = vrot.lane.b32.xlu0 %v2931_v46, %s3281_s17  ;;  %2927 = vrot.lane.b32.xlu1 %v2926_v17, %s3280_s16 }
 0x186   : > { %v2595_v22 = vpop.f32.mrf.mxu0 }
 0x187   : > { %910 = vst.msk [vmem:[#allocation2 + $0x41] sm:$0xff] %vm224_vm0, %v902_v52  ;;  %v812_v35 = vadd.f32 %v2594_v53, %v3640_v62 }
 0x188   : > { %v2596_v60 = vpop.f32.mrf.mxu0 }
 0x189   : > { %v877_v37 = vadd.f32 %v876_v8, %v812_v35  ;;  %v2597_v61 = vadd.f32 %v2596_v60, %v2595_v22  ;;  %2937 = vrot.lane.b32.xlu1 %v2936_v59, %s3282_s10 }
 0x18a   : > { %v980_v63 = vld [vmem:[#allocation2 + $0x32] sm:$0xff] }
 0x18b   : > { %v3698_v2 = vld [vmem:[#allocation2 + $0x30] sm:$0xff]  ;;  %v895_v5 = vmul.f32 0.1, %v877_v37  ;;  %v815_v6 = vadd.f32 %v2597_v61, %v3640_v62  ;;  %v1229_v9 = vpack.c.bf16 %v980_v63, %v956_v0  ;;  %v2956_v16 = vpack.i.bf16 %v980_v63, %v956_v0 }
 0x18c   : > { %v3700_v3 = vld [vmem:[#allocation2 + $0x31] sm:$0xff]  ;;  %v2941_v48 = vpack.i.bf16 %v3698_v2, %v3681_v51 }
 0x18d   : > { %v2951_v7 = vpack.i.bf16 %v3700_v3, %v3705_v47  ;;  %v903_v11 = vmax.f32 %v877_v37, %v895_v5  ;;  %v880_v56 = vadd.f32 %v879_v10, %v815_v6  ;;  %2724 = vmatprep.mubr.msk.bf16.mxu0 %vm224_vm0, %v1229_v9 }
 0x18e   : > { %2942 = vrot.lane.b32.xlu0 %v2941_v48, %s3280_s16  ;;  %v2598_v12 = vpop.f32.mrf.mxu0  ;;  %v958_v19 = vld [vmem:[#allocation2 + $0x42] sm:$0xff] }
 0x18f   : > { %2952 = vrot.lane.b32.xlu1 %v2951_v7, %s3281_s17  ;;  %911 = vst.msk [vmem:[#allocation2 + $0x51] sm:$0xff] %vm224_vm0, %v903_v11  ;;  %v896_v14 = vmul.f32 0.1, %v880_v56  ;;  %v3714_v24 = vld [vmem:[#allocation2 + $0x40] sm:$0xff]  ;;  %v2961_v29 = vpack.i.bf16 %v958_v19, %v980_v63 }
 0x190   : > { %v2599_v15 = vpop.f32.mrf.mxu0  ;;  %v2966_v33 = vpack.i.bf16 %v3714_v24, %v3698_v2  ;;  %v3731_v44 = vld [vmem:[#allocation2 + $0x41] sm:$0xff] }
 0x191   : > { %v904_v20 = vmax.f32 %v880_v56, %v896_v14  ;;  %v2600_v21 = vadd.f32 %v2599_v15, %v2598_v12 }
 0x192   : > { %2947 = vrot.lane.b32.xlu0 %v2951_v7, %s3282_s10  ;;  %v2601_v27 = vpop.f32.mrf.mxu0 }
 0x193   : > { %2957 = vrot.lane.b32.xlu1 %v2956_v16, %s3280_s16  ;;  %912 = vst.msk [vmem:[#allocation2 + $0x61] sm:$0xff] %vm224_vm0, %v904_v20  ;;  %v820_v28 = vadd.f32 %v2600_v21, %v3640_v62 }
 0x194   : > { %v2602_v32 = vpop.f32.mrf.mxu0 }
 0x195   : > { %v885_v34 = vadd.f32 %v3670_v38, %v820_v28  ;;  %v2603_v36 = vadd.f32 %v2602_v32, %v2601_v27 }
 0x196   : > { %2962 = vrot.lane.b32.xlu0 %v2961_v29, %s3281_s17  ;;  %v982_v39 = vld [vmem:[#allocation2 + $0x52] sm:$0xff] }
 0x197   : > { %2967 = vrot.lane.b32.xlu1 %v2966_v33, %s3282_s10  ;;  %v3724_v25 = vld [vmem:[#allocation2 + $0x50] sm:$0xff]  ;;  %v897_v55 = vmul.f32 0.1, %v885_v34  ;;  %v823_v41 = vadd.f32 %v2603_v36, %v3640_v62  ;;  %v1232_v42 = vpack.c.bf16 %v982_v39, %v958_v19  ;;  %v2986_v0 = vpack.i.bf16 %v982_v39, %v958_v19 }
 0x198   : > { %v3726_v40 = vld [vmem:[#allocation2 + $0x51] sm:$0xff]  ;;  %v2971_v43 = vpack.i.bf16 %v3724_v25, %v3714_v24 }
 0x199   : > { %v2981_v38 = vpack.i.bf16 %v3726_v40, %v3731_v44  ;;  %v905_v45 = vmax.f32 %v885_v34, %v897_v55  ;;  %v888_v1 = vadd.f32 %v2719_v30, %v823_v41  ;;  %2725 = vmatmul.mubr.msk.bf16.vlgmr.msra.gmra.mxu0 %vm224_vm0, %v1232_v42 }
 0x19a   : > { %2972 = vrot.lane.b32.xlu0 %v2971_v43, %s3280_s16  ;;  %v960_v23 = vld [vmem:[#allocation2 + $0x62] sm:$0xff] }
 0x19b   : > { %2982 = vrot.lane.b32.xlu1 %v2981_v38, %s3281_s17  ;;  %913 = vst.msk [vmem:[#allocation2 + $0x71] sm:$0xff] %vm224_vm0, %v905_v45  ;;  %v898_v62 = vmul.f32 0.1, %v888_v1  ;;  %v3740_v17 = vld [vmem:[#allocation2 + $0x60] sm:$0xff]  ;;  %v2991_v49 = vpack.i.bf16 %v960_v23, %v982_v39 }
 0x19c   : > { %v2996_v8 = vpack.i.bf16 %v3740_v17, %v3724_v25  ;;  %v3747_v50 = vld [vmem:[#allocation2 + $0x61] sm:$0xff] }
 0x19d   : > { %v906_v46 = vmax.f32 %v888_v1, %v898_v62 }
 0x19e   : > { %2977 = vrot.lane.b32.xlu0 %v2981_v38, %s3282_s10 }
 0x19f   : > { %2987 = vrot.lane.b32.xlu1 %v2986_v0, %s3280_s16  ;;  %914 = vst.msk [vmem:[#allocation2 + $0x81] sm:$0xff] %vm224_vm0, %v906_v46 }
 0x1a2   : > { %2992 = vrot.lane.b32.xlu0 %v2991_v49, %s3281_s17  ;;  %v984_v52 = vld [vmem:[#allocation2 + $0x72] sm:$0xff] }
 0x1a3   : > { %2997 = vrot.lane.b32.xlu1 %v2996_v8, %s3282_s10  ;;  %v3750_v53 = vld [vmem:[#allocation2 + $0x70] sm:$0xff]  ;;  %v1235_v22 = vpack.c.bf16 %v984_v52, %v960_v23  ;;  %v3016_v60 = vpack.i.bf16 %v984_v52, %v960_v23 }
 0x1a4   : > { %v3752_v54 = vld [vmem:[#allocation2 + $0x71] sm:$0xff]  ;;  %v3001_v58 = vpack.i.bf16 %v3750_v53, %v3740_v17 }
 0x1a5   : > { %v3011_v35 = vpack.i.bf16 %v3752_v54, %v3747_v50  ;;  %2728 = vmatprep.mubr.msk.bf16.mxu0 %vm224_vm0, %v1235_v22 }
 0x1a6   : > { %3002 = vrot.lane.b32.xlu0 %v3001_v58, %s3280_s16  ;;  %v985_v59 = vld [vmem:[#allocation2 + $0x82] sm:$0xff] }
 0x1a7   : > { %3012 = vrot.lane.b32.xlu1 %v3011_v35, %s3281_s17  ;;  %v1238_v30 = vpack.c.bf16 %v3510_v4, %v985_v59  ;;  %v946_v37 = vld [vmem:[#allocation2 + $0x80] sm:$0xff]  ;;  %v3021_v61 = vpack.i.bf16 %v985_v59, %v984_v52 }
 0x1a8   : > { %v3036_v63 = vpack.i.bf16 %v946_v37, %v3750_v53  ;;  %v3026_v5 = vpack.i.bf16 %v3530_v13, %v946_v37  ;;  %v3769_v6 = vld [vmem:[#allocation2 + $0x81] sm:$0xff] }
 0x1a9   : > { %2729 = vmatmul.mubr.msk.bf16.gmra.mxu0 %vm224_vm0, %v1238_v30  ;;  %v3031_v4 = vpack.i.bf16 %v3538_v18, %v3769_v6 }
 0x1aa   : > { %3007 = vrot.lane.b32.xlu0 %v3011_v35, %s3282_s10 }
 0x1ab   : > { %3017 = vrot.lane.b32.xlu1 %v3016_v60, %s3280_s16 }
 0x1ae   : > { %3022 = vrot.lane.b32.xlu0 %v3021_v61, %s3281_s17 }
 0x1af   : > { %3037 = vrot.lane.b32.xlu1 %v3036_v63, %s3282_s10 }
 0x1b2   : > { %3027 = vrot.lane.b32.xlu0 %v3026_v5, %s3280_s16 }
 0x1b6   : > { %3032 = vrot.lane.b32.xlu0 %v3031_v4, %s3282_s10 }
 0x1f3   : > { %v2923_v9 = vpop.permute.xlu1 %2922 }
 0x1f4   : > { %v2925_v11 = vunpack.i.h.bf16 %v2923_v9  ;;  %v2924_v56 = vunpack.i.l.bf16 %v2923_v9 }
 0x1f6   : > { %v1179_v18 = vsel %vm224_vm0, %v3547_v31, %v2924_v56  ;;  %v1180_v29 = vsel %vm224_vm0, %v3688_v57, %v2925_v11 }
 0x1f7   : > { %v2928_v48 = vpop.permute.xlu1 %2927  ;;  %v2933_v10 = vpop.permute.xlu0 %2932 }
 0x1f8   : > { %v2935_v12 = vunpack.i.h.bf16 %v2933_v10  ;;  %v2934_v14 = vunpack.i.l.bf16 %v2933_v10  ;;  %v2930_v16 = vunpack.i.h.bf16 %v2928_v48  ;;  %v2929_v13 = vunpack.i.l.bf16 %v2928_v48 }
 0x1fa   : > { %v1204_v32 = vsel %vm224_vm0, %v3705_v47, %v2935_v12  ;;  %v1203_v33 = vsel %vm224_vm0, %v3662_v26, %v2934_v14  ;;  %v1187_v36 = vsel %vm544_vm2, %v1179_v18, %v2929_v13  ;;  %v1188_v39 = vsel %vm544_vm2, %v1180_v29, %v2930_v16 }
 0x1fb   : > { %v2938_v7 = vpop.permute.xlu1 %2937 }
 0x1fc   : > { %v2940_v20 = vunpack.i.h.bf16 %v2938_v7  ;;  %v2939_v21 = vunpack.i.l.bf16 %v2938_v7 }
 0x1fe   : > { %v1195_v43 = vsel %vm553_vm3, %v1187_v36, %v2939_v21  ;;  %v1196_v31 = vsel %vm553_vm3, %v1188_v39, %v2940_v20 }
 0x1ff   : > { %v1227_v62 = vpack.c.bf16 %v1196_v31, %v1195_v43 }
 0x200   : > { %v2943_v15 = vpop.permute.xlu0 %2942 }
 0x201   : > { %v2953_v19 = vpop.permute.xlu1 %2952  ;;  %v2945_v27 = vunpack.i.h.bf16 %v2943_v15  ;;  %v2944_v28 = vunpack.i.l.bf16 %v2943_v15 }
 0x202   : > { %v2955_v23 = vunpack.i.h.bf16 %v2953_v19  ;;  %v2954_v46 = vunpack.i.l.bf16 %v2953_v19 }
 0x203   : > { %v1211_v57 = vsel %vm544_vm2, %v1203_v33, %v2944_v28  ;;  %v1212_v38 = vsel %vm544_vm2, %v1204_v32, %v2945_v27 }
 0x204   : > { %v2948_v34 = vpop.permute.xlu0 %2947  ;;  %v1182_v61 = vsel %vm224_vm0, %v3698_v2, %v2955_v23  ;;  %v1181_v63 = vsel %vm224_vm0, %v3681_v51, %v2954_v46 }
 0x205   : > { %v2950_v55 = vunpack.i.h.bf16 %v2948_v34  ;;  %v2949_v41 = vunpack.i.l.bf16 %v2948_v34  ;;  %v2958_v42 = vpop.permute.xlu1 %2957 }
 0x206   : > { %v2960_v49 = vunpack.i.h.bf16 %v2958_v42  ;;  %v2959_v8 = vunpack.i.l.bf16 %v2958_v42 }
 0x207   : > { %v1219_v47 = vsel %vm553_vm3, %v1211_v57, %v2949_v41  ;;  %v1220_v26 = vsel %vm553_vm3, %v1212_v38, %v2950_v55 }
 0x208   : > { %v2963_v45 = vpop.permute.xlu0 %2962  ;;  %v1228_v1 = vpack.c.bf16 %v1220_v26, %v1219_v47  ;;  %v1189_v5 = vsel %vm544_vm2, %v1181_v63, %v2959_v8  ;;  %v1190_v4 = vsel %vm544_vm2, %v1182_v61, %v2960_v49 }
 0x209   : > { %v2968_v0 = vpop.permute.xlu1 %2967  ;;  %v2965_v22 = vunpack.i.h.bf16 %v2963_v45  ;;  %v2964_v58 = vunpack.i.l.bf16 %v2963_v45 }
 0x20a   : > { %1436 = vmatprep.mubr.bf16.mxu1 %v1228_v1  ;;  %v2970_v59 = vunpack.i.h.bf16 %v2968_v0  ;;  %v2969_v30 = vunpack.i.l.bf16 %v2968_v0 }
 0x20b   : > { %1437 = vmatmul.mubr.bf16.vlgmr.msra.gmra.mxu1 %v1227_v62  ;;  %v1206_v48 = vsel %vm224_vm0, %v3731_v44, %v2965_v22  ;;  %v1205_v10 = vsel %vm224_vm0, %v3700_v3, %v2964_v58 }
 0x20c   : > { %v2973_v52 = vpop.permute.xlu0 %2972  ;;  %v1197_v51 = vsel %vm553_vm3, %v1189_v5, %v2969_v30  ;;  %v1198_v14 = vsel %vm553_vm3, %v1190_v4, %v2970_v59 }
 0x20d   : > { %v2983_v35 = vpop.permute.xlu1 %2982  ;;  %v2975_v60 = vunpack.i.h.bf16 %v2973_v52  ;;  %v2974_v37 = vunpack.i.l.bf16 %v2973_v52  ;;  %v1230_v20 = vpack.c.bf16 %v1198_v14, %v1197_v51 }
 0x20e   : > { %v2985_v3 = vunpack.i.h.bf16 %v2983_v35  ;;  %v2984_v21 = vunpack.i.l.bf16 %v2983_v35 }
 0x20f   : > { %v1213_v12 = vsel %vm544_vm2, %v1205_v10, %v2974_v37  ;;  %v1214_v2 = vsel %vm544_vm2, %v1206_v48, %v2975_v60 }
 0x210   : > { %v2978_v9 = vpop.permute.xlu0 %2977  ;;  %v1184_v41 = vsel %vm224_vm0, %v3724_v25, %v2985_v3  ;;  %v1183_v42 = vsel %vm224_vm0, %v3714_v24, %v2984_v21  ;;  %v3201_v3 = vld [vmem:[%s4129_s1 + $0x190] sm:$0xff]  }
 0x211   : > { %v2980_v7 = vunpack.i.h.bf16 %v2978_v9  ;;  %v2979_v11 = vunpack.i.l.bf16 %v2978_v9  ;;  %v2988_v56 = vpop.permute.xlu1 %2987  ;;  %v3202_v21 = vld [vmem:[%s4129_s1 + $0x150] sm:$0xff]  }
 0x212   : > { %v2990_v27 = vunpack.i.h.bf16 %v2988_v56  ;;  %v2989_v28 = vunpack.i.l.bf16 %v2988_v56 }
 0x213   : > { %v1221_v15 = vsel %vm553_vm3, %v1213_v12, %v2979_v11  ;;  %v1222_v16 = vsel %vm553_vm3, %v1214_v2, %v2980_v7 }
 0x214   : > { %v2993_v13 = vpop.permute.xlu0 %2992  ;;  %v1231_v44 = vpack.c.bf16 %v1222_v16, %v1221_v15  ;;  %v1191_v43 = vsel %vm544_vm2, %v1183_v42, %v2989_v28  ;;  %v1192_v31 = vsel %vm544_vm2, %v1184_v41, %v2990_v27  ;;  %v3203_v27 = vld [vmem:[%s4129_s1 + $0x188] sm:$0xff]  }
 0x215   : > { %v2998_v19 = vpop.permute.xlu1 %2997  ;;  %v2995_v29 = vunpack.i.h.bf16 %v2993_v13  ;;  %v2994_v32 = vunpack.i.l.bf16 %v2993_v13  ;;  %v3204_v28 = vld [vmem:[%s4129_s1 + $0x148] sm:$0xff]  }
 0x216   : > { %1444 = vmatprep.mubr.bf16.mxu1 %v1231_v44  ;;  %v3000_v34 = vunpack.i.h.bf16 %v2998_v19  ;;  %v2999_v36 = vunpack.i.l.bf16 %v2998_v19  ;;  %v3199_v19 = vld [vmem:[%s4129_s1 + $0x198] sm:$0xff]  }
 0x217   : > { %1445 = vmatmul.mubr.bf16.gmra.mxu1 %v1230_v20  ;;  %v1208_v38 = vsel %vm224_vm0, %v3747_v50, %v2995_v29  ;;  %v1207_v47 = vsel %vm224_vm0, %v3726_v40, %v2994_v32  ;;  %v3200_v20 = vld [vmem:[%s4129_s1 + $0x158] sm:$0xff]   ;;  %2656 = vmatprep.subr.bf16.mxu1 %v3199_v19  ;;  %v3214_v19 = vld [vmem:[%s4129_s1 + $0x120] sm:$0xff]  }
 0x218   : > { %v3003_v18 = vpop.permute.xlu0 %3002  ;;  %v1199_v24 = vsel %vm553_vm3, %v1191_v43, %v2999_v36  ;;  %v1200_v0 = vsel %vm553_vm3, %v1192_v31, %v3000_v34  ;;  %2657 = vmatpush3.bf16.msra.mxu1 %v3200_v20 }
 0x219   : > { %v3013_v33 = vpop.permute.xlu1 %3012  ;;  %v3005_v39 = vunpack.i.h.bf16 %v3003_v18  ;;  %v3004_v55 = vunpack.i.l.bf16 %v3003_v18  ;;  %v1233_v8 = vpack.c.bf16 %v1200_v0, %v1199_v24  ;;  %2658 = vmatprep.subr.bf16.mxu1 %v3201_v3 }
 0x21a   : > { %v3015_v40 = vunpack.i.h.bf16 %v3013_v33  ;;  %v3014_v52 = vunpack.i.l.bf16 %v3013_v33  ;;  %v3866_v33 = vld [vmem:[%s4130_s2 + $0x1] ss:$0 sm:$0xff] }
 0x21b   : > { %v1215_v62 = vsel %vm544_vm2, %v1207_v47, %v3004_v55  ;;  %v1216_v25 = vsel %vm544_vm2, %v1208_v38, %v3005_v39 }
 0x21c   : > { %v3008_v57 = vpop.permute.xlu0 %3007  ;;  %v1186_v4 = vsel %vm224_vm0, %v3750_v53, %v3015_v40  ;;  %v1185_v9 = vsel %vm224_vm0, %v3740_v17, %v3014_v52  ;;  %2659 = vmatpush3.bf16.msra.mxu1 %v3202_v21 }
 0x21d   : > { %v3010_v26 = vunpack.i.h.bf16 %v3008_v57  ;;  %v3009_v45 = vunpack.i.l.bf16 %v3008_v57  ;;  %v3018_v1 = vpop.permute.xlu1 %3017  ;;  %2660 = vmatprep.subr.bf16.mxu1 %v3203_v27 }
 0x21e   : > { %v3020_v58 = vunpack.i.h.bf16 %v3018_v1  ;;  %v3019_v35 = vunpack.i.l.bf16 %v3018_v1  ;;  %v3205_v1 = vld [vmem:[%s4129_s1 + $0x180] sm:$0xff]  }
 0x21f   : > { %v1223_v23 = vsel %vm553_vm3, %v1215_v62, %v3009_v45  ;;  %v1224_v46 = vsel %vm553_vm3, %v1216_v25, %v3010_v26  ;;  %v3206_v25 = vld [vmem:[%s4129_s1 + $0x140] sm:$0xff]  }
 0x220   : > { %v3023_v49 = vpop.permute.xlu0 %3022  ;;  %v1234_v50 = vpack.c.bf16 %v1224_v46, %v1223_v23  ;;  %v1193_v48 = vsel %vm544_vm2, %v1185_v9, %v3019_v35  ;;  %v1194_v10 = vsel %vm544_vm2, %v1186_v4, %v3020_v58  ;;  %2661 = vmatpush3.bf16.msra.mxu1 %v3204_v28  ;;  %v1574_v9 = vld [vmem:[#allocation2 + $0x2] sm:$0xff] }
 0x221   : > { %v3038_v22 = vpop.permute.xlu1 %3037  ;;  %v3025_v30 = vunpack.i.h.bf16 %v3023_v49  ;;  %v3024_v60 = vunpack.i.l.bf16 %v3023_v49  ;;  %2662 = vmatprep.subr.bf16.mxu1 %v3205_v1  ;;  %v3207_v49 = vld [vmem:[%s4129_s1 + $0x178] sm:$0xff]  }
 0x222   : > { %1452 = vmatprep.mubr.bf16.mxu1 %v1234_v50  ;;  %v3040_v37 = vunpack.i.h.bf16 %v3038_v22  ;;  %v3039_v61 = vunpack.i.l.bf16 %v3038_v22  ;;  %v1566_v22 = vld [vmem:[#allocation2 + $0x1] sm:$0xff] }
 0x223   : > { %1453 = vmatmul.mubr.bf16.gmra.mxu1 %v1233_v8  ;;  %v1210_v11 = vsel %vm224_vm0, %v3769_v6, %v3025_v30  ;;  %v1209_v56 = vsel %vm224_vm0, %v3752_v54, %v3024_v60  ;;  %v3197_v54 = vld [vmem:[%s4129_s1 + $0x1a8] sm:$0xff]   ;;  %v3198_v6 = vld [vmem:[%s4129_s1 + $0x1a0] sm:$0xff]   ;;  %v3208_v8 = vld [vmem:[%s4129_s1 + $0x138] sm:$0xff]  }
 0x224   : > { %v3028_v59 = vpop.permute.xlu0 %3027  ;;  %v1201_v14 = vsel %vm553_vm3, %v1193_v48, %v3039_v61  ;;  %v1202_v17 = vsel %vm553_vm3, %v1194_v10, %v3040_v37  ;;  %2732 = vmatprep.subr.bf16.mxu0 %v3197_v54  ;;  %2663 = vmatpush3.bf16.msra.mxu1 %v3206_v25 }
 0x225   : > { %v3030_v63 = vunpack.i.h.bf16 %v3028_v59  ;;  %v3029_v5 = vunpack.i.l.bf16 %v3028_v59  ;;  %v1236_v44 = vpack.c.bf16 %v1202_v17, %v1201_v14  ;;  %2733 = vmatpush3.bf16.msra.mxu0 %v3197_v54  ;;  %2664 = vmatprep.subr.bf16.mxu1 %v3207_v49  ;;  %v3209_v59 = vld [vmem:[%s4129_s1 + $0x170] sm:$0xff]  }
 0x226   : > { %2734 = vmatprep.subr.bf16.mxu0 %v3198_v6 }
 0x227   : > { %v1217_v51 = vsel %vm544_vm2, %v1209_v56, %v3029_v5  ;;  %v1218_v53 = vsel %vm544_vm2, %v1210_v11, %v3030_v63  ;;  %v3210_v63 = vld [vmem:[%s4129_s1 + $0x130] sm:$0xff]  }
 0x228   : > { %v3033_v7 = vpop.permute.xlu0 %3032  ;;  %2665 = vmatpush3.bf16.msra.mxu1 %v3208_v8 }
 0x229   : > { %v3035_v12 = vunpack.i.h.bf16 %v3033_v7  ;;  %v3034_v2 = vunpack.i.l.bf16 %v3033_v7  ;;  %2735 = vmatpush3.bf16.msra.mxu0 %v3198_v6  ;;  %2666 = vmatprep.subr.bf16.mxu1 %v3209_v59  ;;  %v3211_v7 = vld [vmem:[%s4129_s1 + $0x168] sm:$0xff]  }
 0x22b   : > { %v1225_v15 = vsel %vm553_vm3, %v1217_v51, %v3034_v2  ;;  %v1226_v16 = vsel %vm553_vm3, %v1218_v53, %v3035_v12  ;;  %v3212_v53 = vld [vmem:[%s4129_s1 + $0x128] sm:$0xff]  }
 0x22c   : > { %v1237_v13 = vpack.c.bf16 %v1226_v16, %v1225_v15  ;;  %2667 = vmatpush3.bf16.msra.mxu1 %v3210_v63 }
 0x22d   : > { %2668 = vmatprep.subr.bf16.mxu1 %v3211_v7 }
 0x22e   : > { %1460 = vmatprep.mubr.bf16.mxu1 %v1237_v13 }
 0x22f   : > { %1461 = vmatmul.mubr.bf16.gmra.mxu1 %v1236_v44  ;;  %v3213_v44 = vld [vmem:[%s4129_s1 + $0x160] sm:$0xff]  }
 0x230   : > { %2669 = vmatpush3.bf16.msra.mxu1 %v3212_v53 }
 0x231   : > { %2670 = vmatprep.subr.bf16.mxu1 %v3213_v44  ;;  %v1629_v44 = vld [vmem:[#allocation2 + $0x92] sm:$0xff] }
 0x234   : > { %2671 = vmatpush3.bf16.msra.mxu1 %v3214_v19 }
 0x259   : > { %v2726_v18 = vpop.f32.mrf.mxu0 }
 0x25b   : > { %v1503_v32 = vpop.f32.mrf.mxu0 }
 0x25d   : > { %v2727_v41 = vpop.f32.mrf.mxu0 }
 0x25f   : > { %v1506_v47 = vpop.f32.mrf.mxu0 }
 0x269   : > { %v3895_v5 = vpop.f32.mrf.mxu0 }
 0x26b   : > { %v1519_v14 = vpop.f32.mrf.mxu0 }
 0x26d   : > { %v2731_v21 = vpop.f32.mrf.mxu0 }
 0x2cb   : > { %v2626_v29 = vpop.f32.mrf.mxu1 }
 0x2cd   : > { %v2627_v34 = vpop.f32.mrf.mxu1 }
 0x2ce   : > { %v2628_v36 = vadd.f32 %v2627_v34, %v2626_v29 }
 0x2cf   : > { %v2629_v39 = vpop.f32.mrf.mxu1 }
 0x2d0   : > { %v1439_v55 = vadd.f32 %v2628_v36, %v3866_v33 }
 0x2d1   : > { %v2630_v42 = vpop.f32.mrf.mxu1 }
 0x2d2   : > { %v1504_v43 = vadd.f32 %v1503_v32, %v1439_v55  ;;  %v2631_v31 = vadd.f32 %v2630_v42, %v2629_v39 }
 0x2d4   : > { %v1534_v57 = vmul.f32 0.1, %v1504_v43  ;;  %v1442_v38 = vadd.f32 %v2631_v31, %v3866_v33 }
 0x2d6   : > { %v1542_v26 = vmax.f32 %v1504_v43, %v1534_v57  ;;  %v1507_v45 = vadd.f32 %v1506_v47, %v1442_v38  ;;  %v1522_v43 = vpop.f32.mrf.mxu0 }
 0x2d7   : > { %v2632_v62 = vpop.f32.mrf.mxu1 }
 0x2d8   : > { %1550 = vst.msk [vmem:[#allocation2 + $0x11] sm:$0xff] %vm224_vm0, %v1542_v26  ;;  %v1535_v24 = vmul.f32 0.1, %v1507_v45 }
 0x2d9   : > { %v2633_v0 = vpop.f32.mrf.mxu1 }
 0x2da   : > { %v1543_v23 = vmax.f32 %v1507_v45, %v1535_v24  ;;  %v2634_v46 = vadd.f32 %v2633_v0, %v2632_v62 }
 0x2db   : > { %v2635_v50 = vpop.f32.mrf.mxu1 }
 0x2dc   : > { %1551 = vst.msk [vmem:[#allocation2 + $0x21] sm:$0xff] %vm224_vm0, %v1543_v23  ;;  %v1447_v40 = vadd.f32 %v2634_v46, %v3866_v33 }
 0x2dd   : > { %v2636_v52 = vpop.f32.mrf.mxu1 }
 0x2de   : > { %v1512_v58 = vadd.f32 %v2726_v18, %v1447_v40  ;;  %v2637_v35 = vadd.f32 %v2636_v52, %v2635_v50 }
 0x2df   : > { %v3888_v30 = vld [vmem:[#allocation2 + $0x11] sm:$0xff] }
 0x2e0   : > { %v1536_v60 = vmul.f32 0.1, %v1512_v58  ;;  %v1450_v37 = vadd.f32 %v2637_v35, %v3866_v33  ;;  %v3041_v61 = vpack.i.bf16 %v3888_v30, %v1566_v22  ;;  %v1598_v4 = vld [vmem:[#allocation2 + $0x12] sm:$0xff] }
 0x2e1   : > { %v3046_v51 = vpack.i.bf16 %v1598_v4, %v1574_v9  ;;  %v3912_v6 = vld [vmem:[#allocation2 + $0x10] sm:$0xff] }
 0x2e2   : > { %v1544_v48 = vmax.f32 %v1512_v58, %v1536_v60  ;;  %v1515_v10 = vadd.f32 %v2727_v41, %v1450_v37  ;;  %3042 = vrot.lane.b32.xlu1 %v3041_v61, %s3281_s17 }
 0x2e3   : > { %v2638_v11 = vpop.f32.mrf.mxu1  ;;  %v1599_v56 = vld [vmem:[#allocation2 + $0x22] sm:$0xff] }
 0x2e4   : > { %1552 = vst.msk [vmem:[#allocation2 + $0x31] sm:$0xff] %vm224_vm0, %v1544_v48  ;;  %v1537_v12 = vmul.f32 0.1, %v1515_v10  ;;  %v3051_v2 = vpack.i.bf16 %v1599_v56, %v1598_v4  ;;  %v3905_v15 = vld [vmem:[#allocation2 + $0x20] sm:$0xff] }
 0x2e5   : > { %v2639_v17 = vpop.f32.mrf.mxu1  ;;  %v3056_v3 = vpack.i.bf16 %v3905_v15, %v3912_v6  ;;  %v3929_v42 = vld [vmem:[#allocation2 + $0x21] sm:$0xff] }
 0x2e6   : > { %v1545_v16 = vmax.f32 %v1515_v10, %v1537_v12  ;;  %v2640_v13 = vadd.f32 %v2639_v17, %v2638_v11  ;;  %3052 = vrot.lane.b32.xlu0 %v3051_v2, %s3281_s17  ;;  %3047 = vrot.lane.b32.xlu1 %v3046_v51, %s3280_s16 }
 0x2e7   : > { %v2641_v54 = vpop.f32.mrf.mxu1 }
 0x2e8   : > { %1553 = vst.msk [vmem:[#allocation2 + $0x41] sm:$0xff] %vm224_vm0, %v1545_v16  ;;  %v1455_v20 = vadd.f32 %v2640_v13, %v3866_v33 }
 0x2e9   : > { %v2642_v27 = vpop.f32.mrf.mxu1 }
 0x2ea   : > { %v1520_v28 = vadd.f32 %v1519_v14, %v1455_v20  ;;  %v2643_v18 = vadd.f32 %v2642_v27, %v2641_v54  ;;  %3057 = vrot.lane.b32.xlu1 %v3056_v3, %s3282_s10 }
 0x2eb   : > { %v1623_v29 = vld [vmem:[#allocation2 + $0x32] sm:$0xff] }
 0x2ec   : > { %v3922_v32 = vld [vmem:[#allocation2 + $0x30] sm:$0xff]  ;;  %v1538_v36 = vmul.f32 0.1, %v1520_v28  ;;  %v1458_v39 = vadd.f32 %v2643_v18, %v3866_v33  ;;  %v1872_v55 = vpack.c.bf16 %v1623_v29, %v1599_v56  ;;  %v3076_v1 = vpack.i.bf16 %v1623_v29, %v1599_v56 }
 0x2ed   : > { %v3924_v34 = vld [vmem:[#allocation2 + $0x31] sm:$0xff]  ;;  %v3061_v41 = vpack.i.bf16 %v3922_v32, %v3905_v15 }
 0x2ee   : > { %v3071_v31 = vpack.i.bf16 %v3924_v34, %v3929_v42  ;;  %v1546_v57 = vmax.f32 %v1520_v28, %v1538_v36  ;;  %v1523_v38 = vadd.f32 %v1522_v43, %v1458_v39  ;;  %2736 = vmatprep.mubr.msk.bf16.mxu0 %vm224_vm0, %v1872_v55  ;;  %v1613_v28 = vld [vmem:[#allocation2 + $0x90] sm:$0xff] }
 0x2ef   : > { %3062 = vrot.lane.b32.xlu0 %v3061_v41, %s3280_s16  ;;  %v2644_v47 = vpop.f32.mrf.mxu1  ;;  %v1601_v62 = vld [vmem:[#allocation2 + $0x42] sm:$0xff]  ;;  %v1621_v36 = vld [vmem:[#allocation2 + $0x91] sm:$0xff] }
 0x2f0   : > { %3072 = vrot.lane.b32.xlu1 %v3071_v31, %s3281_s17  ;;  %1554 = vst.msk [vmem:[#allocation2 + $0x51] sm:$0xff] %vm224_vm0, %v1546_v57  ;;  %v1539_v26 = vmul.f32 0.1, %v1523_v38  ;;  %v3938_v0 = vld [vmem:[#allocation2 + $0x40] sm:$0xff]  ;;  %v3081_v49 = vpack.i.bf16 %v1601_v62, %v1623_v29 }
 0x2f1   : > { %v2645_v45 = vpop.f32.mrf.mxu1  ;;  %v3086_v8 = vpack.i.bf16 %v3938_v0, %v3922_v32  ;;  %v3955_v63 = vld [vmem:[#allocation2 + $0x41] sm:$0xff] }
 0x2f2   : > { %v1547_v25 = vmax.f32 %v1523_v38, %v1539_v26  ;;  %v2646_v24 = vadd.f32 %v2645_v45, %v2644_v47 }
 0x2f3   : > { %3067 = vrot.lane.b32.xlu0 %v3071_v31, %s3282_s10  ;;  %v2647_v23 = vpop.f32.mrf.mxu1 }
 0x2f4   : > { %3077 = vrot.lane.b32.xlu1 %v3076_v1, %s3280_s16  ;;  %1555 = vst.msk [vmem:[#allocation2 + $0x61] sm:$0xff] %vm224_vm0, %v1547_v25  ;;  %v1463_v46 = vadd.f32 %v2646_v24, %v3866_v33  ;;  %v1558_v1 = vld [vmem:[#allocation2] sm:$0xff] }
 0x2f5   : > { %v2648_v50 = vpop.f32.mrf.mxu1 }
 0x2f6   : > { %v1528_v40 = vadd.f32 %v3895_v5, %v1463_v46  ;;  %v2649_v52 = vadd.f32 %v2648_v50, %v2647_v23 }
 0x2f7   : > { %3082 = vrot.lane.b32.xlu0 %v3081_v49, %s3281_s17  ;;  %v1625_v22 = vld [vmem:[#allocation2 + $0x52] sm:$0xff] }
 0x2f8   : > { %3087 = vrot.lane.b32.xlu1 %v3086_v8, %s3282_s10  ;;  %v3948_v58 = vld [vmem:[#allocation2 + $0x50] sm:$0xff]  ;;  %v1540_v59 = vmul.f32 0.1, %v1528_v40  ;;  %v1466_v60 = vadd.f32 %v2649_v52, %v3866_v33  ;;  %v1875_v37 = vpack.c.bf16 %v1625_v22, %v1601_v62  ;;  %v3106_v48 = vpack.i.bf16 %v1625_v22, %v1601_v62 }
 0x2f9   : > { %v3950_v35 = vld [vmem:[#allocation2 + $0x51] sm:$0xff]  ;;  %v3091_v61 = vpack.i.bf16 %v3948_v58, %v3938_v0 }
 0x2fa   : > { %v3101_v5 = vpack.i.bf16 %v3950_v35, %v3955_v63  ;;  %v1548_v4 = vmax.f32 %v1528_v40, %v1540_v59  ;;  %v1531_v9 = vadd.f32 %v2731_v21, %v1466_v60  ;;  %2737 = vmatmul.mubr.msk.bf16.vlgmr.msra.gmra.mxu0 %vm224_vm0, %v1875_v37 }
 0x2fb   : > { %3092 = vrot.lane.b32.xlu0 %v3091_v61, %s3280_s16  ;;  %v1603_v10 = vld [vmem:[#allocation2 + $0x62] sm:$0xff] }
 0x2fc   : > { %3102 = vrot.lane.b32.xlu1 %v3101_v5, %s3281_s17  ;;  %1556 = vst.msk [vmem:[#allocation2 + $0x71] sm:$0xff] %vm224_vm0, %v1548_v4  ;;  %v1541_v33 = vmul.f32 0.1, %v1531_v9  ;;  %v3964_v11 = vld [vmem:[#allocation2 + $0x60] sm:$0xff]  ;;  %v3111_v56 = vpack.i.bf16 %v1603_v10, %v1625_v22 }
 0x2fd   : > { %v3116_v12 = vpack.i.bf16 %v3964_v11, %v3948_v58  ;;  %v3971_v2 = vld [vmem:[#allocation2 + $0x61] sm:$0xff] }
 0x2fe   : > { %v1549_v7 = vmax.f32 %v1531_v9, %v1541_v33 }
 0x2ff   : > { %3097 = vrot.lane.b32.xlu0 %v3101_v5, %s3282_s10 }
 0x300   : > { %3107 = vrot.lane.b32.xlu1 %v3106_v48, %s3280_s16  ;;  %1557 = vst.msk [vmem:[#allocation2 + $0x81] sm:$0xff] %vm224_vm0, %v1549_v7 }
 0x303   : > { %3112 = vrot.lane.b32.xlu0 %v3111_v56, %s3281_s17  ;;  %v1627_v51 = vld [vmem:[#allocation2 + $0x72] sm:$0xff] }
 0x304   : > { %3117 = vrot.lane.b32.xlu1 %v3116_v12, %s3282_s10  ;;  %v3974_v53 = vld [vmem:[#allocation2 + $0x70] sm:$0xff]  ;;  %v1878_v17 = vpack.c.bf16 %v1627_v51, %v1603_v10  ;;  %v3136_v20 = vpack.i.bf16 %v1627_v51, %v1603_v10 }
 0x305   : > { %v3976_v14 = vld [vmem:[#allocation2 + $0x71] sm:$0xff]  ;;  %v3121_v16 = vpack.i.bf16 %v3974_v53, %v3964_v11 }
 0x306   : > { %v3131_v13 = vpack.i.bf16 %v3976_v14, %v3971_v2  ;;  %2740 = vmatprep.mubr.msk.bf16.mxu0 %vm224_vm0, %v1878_v17 }
 0x307   : > { %3122 = vrot.lane.b32.xlu0 %v3121_v16, %s3280_s16  ;;  %v1628_v54 = vld [vmem:[#allocation2 + $0x82] sm:$0xff] }
 0x308   : > { %3132 = vrot.lane.b32.xlu1 %v3131_v13, %s3281_s17  ;;  %v1881_v19 = vpack.c.bf16 %v1629_v44, %v1628_v54  ;;  %v1589_v3 = vld [vmem:[#allocation2 + $0x80] sm:$0xff]  ;;  %v3141_v21 = vpack.i.bf16 %v1628_v54, %v1627_v51 }
 0x309   : > { %v3156_v27 = vpack.i.bf16 %v1589_v3, %v3974_v53  ;;  %v3146_v18 = vpack.i.bf16 %v1613_v28, %v1589_v3  ;;  %v3991_v29 = vld [vmem:[#allocation2 + $0x81] sm:$0xff] }
 0x30a   : > { %2741 = vmatmul.mubr.msk.bf16.gmra.mxu0 %vm224_vm0, %v1881_v19  ;;  %v3151_v39 = vpack.i.bf16 %v1621_v36, %v3991_v29 }
 0x30b   : > { %3127 = vrot.lane.b32.xlu0 %v3131_v13, %s3282_s10 }
 0x30c   : > { %3137 = vrot.lane.b32.xlu1 %v3136_v20, %s3280_s16 }
 0x30f   : > { %3142 = vrot.lane.b32.xlu0 %v3141_v21, %s3281_s17  ;;  %s3283_s17 = smov [#allocation3]  }
 0x310   : > { %3157 = vrot.lane.b32.xlu1 %v3156_v27, %s3282_s10 }
 0x313   : > { %3147 = vrot.lane.b32.xlu0 %v3146_v18, %s3280_s16  ;;  %s3217_s16 = scalar_lea.vmem %s4084_s11, 1024 }
 0x314   : > { %p3218_p11 = scmp.ne.s32.totalorder %s4084_s11, %s3217_s16 }
 0x316   : > { %p3219_p12 = pnand %p3218_p11, %p3354_p5 }
 0x317   : > { %3152 = vrot.lane.b32.xlu0 %v3151_v39, %s3282_s10  ;;  %s3221_s10 = sshll.u32 %s3283_s17, 4  ;;  %s3222_s10 = int_to_ptr.vmem [resolvable:$false] %s3221_s10 }
 0x318   : > { %p3220_p13 = pneg %p3219_p12  ;;  %s3223_s15 = scalar_lea.vmem %s3222_s10, 2048 }
 0x319   : > { %p3224_p0 = scmp.lt.s32.totalorder %s4084_s11, %s3222_s10  ;;  %p3225_p1 = scmp.lt.s32.totalorder %s3223_s15, %s3217_s16 }
 0x31b   : > { %p3226_p2 = por %p3225_p1, %p3224_p0 }
 0x31d   : > { %p3227_p3 = pnand %p3226_p2, %p3220_p13 }
 0x354   : > { %v3043_v55 = vpop.permute.xlu1 %3042 }
 0x355   : > { %v3045_v57 = vunpack.i.h.bf16 %v3043_v55  ;;  %v3044_v38 = vunpack.i.l.bf16 %v3043_v55 }
 0x357   : > { %v1822_v8 = vsel %vm224_vm0, %v1558_v1, %v3044_v38  ;;  %v1823_v40 = vsel %vm224_vm0, %v3912_v6, %v3045_v57 }
 0x358   : > { %v3048_v41 = vpop.permute.xlu1 %3047  ;;  %v3053_v43 = vpop.permute.xlu0 %3052 }
 0x359   : > { %v3055_v47 = vunpack.i.h.bf16 %v3053_v43  ;;  %v3054_v26 = vunpack.i.l.bf16 %v3053_v43  ;;  %v3050_v62 = vunpack.i.h.bf16 %v3048_v41  ;;  %v3049_v25 = vunpack.i.l.bf16 %v3048_v41 }
 0x35b   : > { %v1847_v52 = vsel %vm224_vm0, %v3929_v42, %v3055_v47  ;;  %v1846_v22 = vsel %vm224_vm0, %v3888_v30, %v3054_v26  ;;  %v1830_v60 = vsel %vm544_vm2, %v1822_v8, %v3049_v25  ;;  %v1831_v37 = vsel %vm544_vm2, %v1823_v40, %v3050_v62 }
 0x35c   : > { %v3058_v31 = vpop.permute.xlu1 %3057 }
 0x35d   : > { %v3060_v23 = vunpack.i.h.bf16 %v3058_v31  ;;  %v3059_v46 = vunpack.i.l.bf16 %v3058_v31 }
 0x35f   : > { %v1838_v9 = vsel %vm553_vm3, %v1830_v60, %v3059_v46  ;;  %v1839_v33 = vsel %vm553_vm3, %v1831_v37, %v3060_v23 }
 0x360   : > { %v1870_v56 = vpack.c.bf16 %v1839_v33, %v1838_v9 }
 0x361   : > { %v3063_v45 = vpop.permute.xlu0 %3062 }
 0x362   : > { %v3073_v24 = vpop.permute.xlu1 %3072  ;;  %v3065_v49 = vunpack.i.h.bf16 %v3063_v45  ;;  %v3064_v50 = vunpack.i.l.bf16 %v3063_v45 }
 0x363   : > { %v3075_v51 = vunpack.i.h.bf16 %v3073_v24  ;;  %v3074_v17 = vunpack.i.l.bf16 %v3073_v24 }
 0x364   : > { %v1854_v6 = vsel %vm544_vm2, %v1846_v22, %v3064_v50  ;;  %v1855_v48 = vsel %vm544_vm2, %v1847_v52, %v3065_v49 }
 0x365   : > { %v3068_v59 = vpop.permute.xlu0 %3067  ;;  %v1825_v18 = vsel %vm224_vm0, %v3922_v32, %v3075_v51  ;;  %v1824_v36 = vsel %vm224_vm0, %v3905_v15, %v3074_v17 }
 0x366   : > { %v3070_v61 = vunpack.i.h.bf16 %v3068_v59  ;;  %v3069_v5 = vunpack.i.l.bf16 %v3068_v59  ;;  %v3078_v4 = vpop.permute.xlu1 %3077 }
 0x367   : > { %v3080_v16 = vunpack.i.h.bf16 %v3078_v4  ;;  %v3079_v13 = vunpack.i.l.bf16 %v3078_v4 }
 0x368   : > { %v1862_v42 = vsel %vm553_vm3, %v1854_v6, %v3069_v5  ;;  %v1863_v30 = vsel %vm553_vm3, %v1855_v48, %v3070_v61 }
 0x369   : > { %v3083_v10 = vpop.permute.xlu0 %3082  ;;  %v1871_v7 = vpack.c.bf16 %v1863_v30, %v1862_v42  ;;  %v1832_v39 = vsel %vm544_vm2, %v1824_v36, %v3079_v13  ;;  %v1833_v55 = vsel %vm544_vm2, %v1825_v18, %v3080_v16 }
 0x36a   : > { %v3088_v12 = vpop.permute.xlu1 %3087  ;;  %v3085_v54 = vunpack.i.h.bf16 %v3083_v10  ;;  %v3084_v19 = vunpack.i.l.bf16 %v3083_v10 }
 0x36b   : > { %2079 = vmatprep.mubr.bf16.mxu1 %v1871_v7  ;;  %v3090_v3 = vunpack.i.h.bf16 %v3088_v12  ;;  %v3089_v21 = vunpack.i.l.bf16 %v3088_v12 }
 0x36c   : > { %2080 = vmatmul.mubr.bf16.vlgmr.msra.gmra.mxu1 %v1870_v56  ;;  %v1849_v43 = vsel %vm224_vm0, %v3955_v63, %v3085_v54  ;;  %v1848_v31 = vsel %vm224_vm0, %v3924_v34, %v3084_v19 }
 0x36d   : > { %v3093_v44 = vpop.permute.xlu0 %3092  ;;  %v1840_v15 = vsel %vm553_vm3, %v1832_v39, %v3089_v21  ;;  %v1841_v45 = vsel %vm553_vm3, %v1833_v55, %v3090_v3 }
 0x36e   : > { %v3103_v20 = vpop.permute.xlu1 %3102  ;;  %v3095_v27 = vunpack.i.h.bf16 %v3093_v44  ;;  %v3094_v28 = vunpack.i.l.bf16 %v3093_v44  ;;  %v1873_v23 = vpack.c.bf16 %v1841_v45, %v1840_v15 }
 0x36f   : > { %v3105_v34 = vunpack.i.h.bf16 %v3103_v20  ;;  %v3104_v46 = vunpack.i.l.bf16 %v3103_v20 }
 0x370   : > { %v1856_v26 = vsel %vm544_vm2, %v1848_v31, %v3094_v28  ;;  %v1857_v32 = vsel %vm544_vm2, %v1849_v43, %v3095_v27 }
 0x371   : > { %v3098_v41 = vpop.permute.xlu0 %3097  ;;  %v1827_v5 = vsel %vm224_vm0, %v3948_v58, %v3105_v34  ;;  %v1826_v4 = vsel %vm224_vm0, %v3938_v0, %v3104_v46  ;;  %v2508_v46 = vld [vmem:[%s4130_s2 + $0x2] ss:$0 sm:$0xff] }
 0x372   : > { %v3100_v57 = vunpack.i.h.bf16 %v3098_v41  ;;  %v3099_v38 = vunpack.i.l.bf16 %v3098_v41  ;;  %v3108_v47 = vpop.permute.xlu1 %3107 }
 0x373   : > { %v3110_v49 = vunpack.i.h.bf16 %v3108_v47  ;;  %v3109_v50 = vunpack.i.l.bf16 %v3108_v47 }
 0x374   : > { %v1864_v1 = vsel %vm553_vm3, %v1856_v26, %v3099_v38  ;;  %v1865_v62 = vsel %vm553_vm3, %v1857_v32, %v3100_v57 }
 0x375   : > { %v3113_v25 = vpop.permute.xlu0 %3112  ;;  %v1874_v63 = vpack.c.bf16 %v1865_v62, %v1864_v1  ;;  %v1834_v9 = vsel %vm544_vm2, %v1826_v4, %v3109_v50  ;;  %v1835_v33 = vsel %vm544_vm2, %v1827_v5, %v3110_v49 }
 0x376   : > { %v3118_v24 = vpop.permute.xlu1 %3117  ;;  %v3115_v40 = vunpack.i.h.bf16 %v3113_v25  ;;  %v3114_v52 = vunpack.i.l.bf16 %v3113_v25 }
 0x377   : > { %2087 = vmatprep.mubr.bf16.mxu1 %v1874_v63  ;;  %v3120_v59 = vunpack.i.h.bf16 %v3118_v24  ;;  %v3119_v60 = vunpack.i.l.bf16 %v3118_v24 }
 0x378   : > { %2088 = vmatmul.mubr.bf16.gmra.mxu1 %v1873_v23  ;;  %v1851_v48 = vsel %vm224_vm0, %v3971_v2, %v3115_v40  ;;  %v1850_v42 = vsel %vm224_vm0, %v3950_v35, %v3114_v52 }
 0x379   : > { %v3123_v8 = vpop.permute.xlu0 %3122  ;;  %v1842_v0 = vsel %vm553_vm3, %v1834_v9, %v3119_v60  ;;  %v1843_v12 = vsel %vm553_vm3, %v1835_v33, %v3120_v59 }
 0x37a   : > { %v3133_v22 = vpop.permute.xlu1 %3132  ;;  %v3125_v37 = vunpack.i.h.bf16 %v3123_v8  ;;  %v3124_v61 = vunpack.i.l.bf16 %v3123_v8  ;;  %v1876_v13 = vpack.c.bf16 %v1843_v12, %v1842_v0 }
 0x37b   : > { %v3135_v35 = vunpack.i.h.bf16 %v3133_v22  ;;  %v3134_v44 = vunpack.i.l.bf16 %v3133_v22 }
 0x37c   : > { %v1858_v56 = vsel %vm544_vm2, %v1850_v42, %v3124_v61  ;;  %v1859_v58 = vsel %vm544_vm2, %v1851_v48, %v3125_v37 }
 0x37d   : > { %v3128_v6 = vpop.permute.xlu0 %3127  ;;  %v1829_v55 = vsel %vm224_vm0, %v3974_v53, %v3135_v35  ;;  %v1828_v41 = vsel %vm224_vm0, %v3964_v11, %v3134_v44 }
 0x37e   : > { %v3130_v30 = vunpack.i.h.bf16 %v3128_v6  ;;  %v3129_v10 = vunpack.i.l.bf16 %v3128_v6  ;;  %v3138_v7 = vpop.permute.xlu1 %3137 }
 0x37f   : > { %v3140_v19 = vunpack.i.h.bf16 %v3138_v7  ;;  %v3139_v20 = vunpack.i.l.bf16 %v3138_v7 }
 0x380   : > { %v1866_v51 = vsel %vm553_vm3, %v1858_v56, %v3129_v10  ;;  %v1867_v17 = vsel %vm553_vm3, %v1859_v58, %v3130_v30 }
 0x381   : > { %v3143_v16 = vpop.permute.xlu0 %3142  ;;  %v1877_v2 = vpack.c.bf16 %v1867_v17, %v1866_v51  ;;  %v1836_v43 = vsel %vm544_vm2, %v1828_v41, %v3139_v20  ;;  %v1837_v31 = vsel %vm544_vm2, %v1829_v55, %v3140_v19 }
 0x382   : > { %v3158_v54 = vpop.permute.xlu1 %3157  ;;  %v3145_v21 = vunpack.i.h.bf16 %v3143_v16  ;;  %v3144_v27 = vunpack.i.l.bf16 %v3143_v16 }
 0x383   : > { %2095 = vmatprep.mubr.bf16.mxu1 %v1877_v2  ;;  %v3160_v28 = vunpack.i.h.bf16 %v3158_v54  ;;  %v3159_v18 = vunpack.i.l.bf16 %v3158_v54 }
 0x384   : > { %2096 = vmatmul.mubr.bf16.gmra.mxu1 %v1876_v13  ;;  %v1853_v38 = vsel %vm224_vm0, %v3991_v29, %v3145_v21  ;;  %v1852_v47 = vsel %vm224_vm0, %v3976_v14, %v3144_v27  ;;  %v3215_v14 = vld [vmem:[%s4131_s3 + $0x8] sm:$0xff]   ;;  %v3216_v29 = vld [vmem:[%s4131_s3] sm:$0xff]  }
 0x385   : > { %v3148_v3 = vpop.permute.xlu0 %3147  ;;  %v1844_v45 = vsel %vm553_vm3, %v1836_v43, %v3159_v18  ;;  %v1845_v11 = vsel %vm553_vm3, %v1837_v31, %v3160_v28  ;;  %2744 = vmatprep.subr.bf16.mxu0 %v3215_v14 }
 0x386   : > { %v3150_v36 = vunpack.i.h.bf16 %v3148_v3  ;;  %v3149_v39 = vunpack.i.l.bf16 %v3148_v3  ;;  %v1879_v63 = vpack.c.bf16 %v1845_v11, %v1844_v45  ;;  %2745 = vmatpush3.bf16.msra.mxu0 %v3215_v14 }
 0x387   : > { %2746 = vmatprep.subr.bf16.mxu0 %v3216_v29 }
 0x388   : > { %v1860_v15 = vsel %vm544_vm2, %v1852_v47, %v3149_v39  ;;  %v1861_v53 = vsel %vm544_vm2, %v1853_v38, %v3150_v36 }
 0x389   : > { %v3153_v57 = vpop.permute.xlu0 %3152 }
 0x38a   : > { %v3155_v26 = vunpack.i.h.bf16 %v3153_v57  ;;  %v3154_v32 = vunpack.i.l.bf16 %v3153_v57  ;;  %2747 = vmatpush3.bf16.msra.mxu0 %v3216_v29 }
 0x38c   : > { %v1868_v1 = vsel %vm553_vm3, %v1860_v15, %v3154_v32  ;;  %v1869_v62 = vsel %vm553_vm3, %v1861_v53, %v3155_v26 }
 0x38d   : > { %v1880_v25 = vpack.c.bf16 %v1869_v62, %v1868_v1 }
 0x38f   : > { %2103 = vmatprep.mubr.bf16.mxu1 %v1880_v25 }
 0x390   : > { %2104 = vmatmul.mubr.bf16.gmra.mxu1 %v1879_v63 }
 0x3ba   : > { %v2738_v24 = vpop.f32.mrf.mxu0 }
 0x3bc   : > { %v2146_v34 = vpop.f32.mrf.mxu0 }
 0x3be   : > { %v2739_v52 = vpop.f32.mrf.mxu0 }
 0x3c0   : > { %v2149_v61 = vpop.f32.mrf.mxu0 }
 0x3ca   : > { %v2742_v17 = vpop.f32.mrf.mxu0 }
 0x3cc   : > { %v2162_v44 = vpop.f32.mrf.mxu0 }
 0x3ce   : > { %v2743_v18 = vpop.f32.mrf.mxu0 }
 0x3d0   : > { %v2165_v43 = vpop.f32.mrf.mxu0 }
 0x42c   : > { %v2672_v23 = vpop.f32.mrf.mxu1 }
 0x42e   : > { %v2673_v49 = vpop.f32.mrf.mxu1 }
 0x42f   : > { %v2674_v50 = vadd.f32 %v2673_v49, %v2672_v23 }
 0x430   : > { %v2675_v8 = vpop.f32.mrf.mxu1 }
 0x431   : > { %v2082_v40 = vadd.f32 %v2674_v50, %v2508_v46 }
 0x432   : > { %v2676_v22 = vpop.f32.mrf.mxu1 }
 0x433   : > { %v2147_v59 = vadd.f32 %v2146_v34, %v2082_v40  ;;  %v2677_v60 = vadd.f32 %v2676_v22, %v2675_v8  ;;  %v2531_v8 = vld [vmem:[%s4132_s4] ss:$0 sm:$0xff] }
 0x435   : > { %v2085_v37 = vadd.f32 %v2677_v60, %v2508_v46  ;;  %v2177_v5 = vmul.f32 0.1, %v2147_v59 }
 0x437   : > { %v2150_v4 = vadd.f32 %v2149_v61, %v2085_v37  ;;  %v2185_v48 = vmax.f32 %v2147_v59, %v2177_v5 }
 0x438   : > { %v2678_v9 = vpop.f32.mrf.mxu1 }
 0x439   : > { %v2178_v33 = vmul.f32 0.1, %v2150_v4 }
 0x43a   : > { %v2679_v6 = vpop.f32.mrf.mxu1 }
 0x43b   : > { %v2186_v42 = vmax.f32 %v2150_v4, %v2178_v33  ;;  %v2680_v30 = vadd.f32 %v2679_v6, %v2678_v9 }
 0x43c   : > { %v2681_v10 = vpop.f32.mrf.mxu1 }
 0x43d   : > { %v2090_v7 = vadd.f32 %v2680_v30, %v2508_v46  ;;  %v2193_v56 = vpack.c.bf16 %v2186_v42, %v2185_v48 }
 0x43e   : > { %v2682_v58 = vpop.f32.mrf.mxu1 }
 0x43f   : > { %v2155_v0 = vadd.f32 %v2738_v24, %v2090_v7  ;;  %v2683_v12 = vadd.f32 %v2682_v58, %v2681_v10  ;;  %2748 = vmatprep.mubr.msk.bf16.mxu0 %vm224_vm0, %v2193_v56 }
 0x441   : > { %v2093_v51 = vadd.f32 %v2683_v12, %v2508_v46  ;;  %v2179_v16 = vmul.f32 0.1, %v2155_v0 }
 0x443   : > { %v2158_v2 = vadd.f32 %v2739_v52, %v2093_v51  ;;  %v2187_v19 = vmax.f32 %v2155_v0, %v2179_v16 }
 0x444   : > { %v2684_v13 = vpop.f32.mrf.mxu1 }
 0x445   : > { %v2180_v35 = vmul.f32 0.1, %v2158_v2 }
 0x446   : > { %v2685_v54 = vpop.f32.mrf.mxu1 }
 0x447   : > { %v2188_v20 = vmax.f32 %v2158_v2, %v2180_v35  ;;  %v2686_v3 = vadd.f32 %v2685_v54, %v2684_v13 }
 0x448   : > { %v2687_v21 = vpop.f32.mrf.mxu1 }
 0x449   : > { %v2194_v27 = vpack.c.bf16 %v2188_v20, %v2187_v19  ;;  %v2098_v28 = vadd.f32 %v2686_v3, %v2508_v46 }
 0x44a   : > { %v2688_v36 = vpop.f32.mrf.mxu1 }
 0x44b   : > { %v2163_v39 = vadd.f32 %v2162_v44, %v2098_v28  ;;  %v2689_v55 = vadd.f32 %v2688_v36, %v2687_v21  ;;  %2749 = vmatmul.mubr.msk.bf16.vlgmr.msra.gmra.mxu0 %vm224_vm0, %v2194_v27 }
 0x44d   : > { %v2101_v41 = vadd.f32 %v2689_v55, %v2508_v46  ;;  %v2181_v31 = vmul.f32 0.1, %v2163_v39 }
 0x44f   : > { %v2166_v57 = vadd.f32 %v2165_v43, %v2101_v41  ;;  %v2189_v32 = vmax.f32 %v2163_v39, %v2181_v31 }
 0x450   : > { %v2690_v38 = vpop.f32.mrf.mxu1 }
 0x451   : > { %v2182_v47 = vmul.f32 0.1, %v2166_v57 }
 0x452   : > { %v2691_v26 = vpop.f32.mrf.mxu1 }
 0x453   : > { %v2190_v15 = vmax.f32 %v2166_v57, %v2182_v47  ;;  %v2692_v53 = vadd.f32 %v2691_v26, %v2690_v38 }
 0x454   : > { %v2693_v45 = vpop.f32.mrf.mxu1 }
 0x455   : > { %v2106_v11 = vadd.f32 %v2692_v53, %v2508_v46  ;;  %v2195_v1 = vpack.c.bf16 %v2190_v15, %v2189_v32 }
 0x456   : > { %v2694_v62 = vpop.f32.mrf.mxu1 }
 0x457   : > { %v2171_v25 = vadd.f32 %v2742_v17, %v2106_v11  ;;  %v2695_v63 = vadd.f32 %v2694_v62, %v2693_v45  ;;  %2752 = vmatprep.mubr.msk.bf16.mxu0 %vm224_vm0, %v2195_v1 }
 0x459   : > { %v2109_v14 = vadd.f32 %v2695_v63, %v2508_v46  ;;  %v2183_v29 = vmul.f32 0.1, %v2171_v25 }
 0x45b   : > { %v2174_v24 = vadd.f32 %v2743_v18, %v2109_v14  ;;  %v2191_v34 = vmax.f32 %v2171_v25, %v2183_v29 }
 0x45d   : > { %v2184_v23 = vmul.f32 0.1, %v2174_v24 }
 0x45f   : > { %v2192_v49 = vmax.f32 %v2174_v24, %v2184_v23 }
 0x461   : > { %v2196_v50 = vpack.c.bf16 %v2192_v49, %v2191_v34 }
 0x463   : > { %2753 = vmatmul.mubr.msk.bf16.gmra.mxu0 %vm224_vm0, %v2196_v50 }
 0x50b   : > { %v2750_v40 = vpop.f32.mrf.mxu0 }
 0x50c   : > { %v2275_v52 = vadd.f32 %v2750_v40, %v2531_v8 }
 0x50d   : > { %v2266_v22 = vpop.f32.mrf.mxu0 }
 0x50e   : > { %2299 = vst [vmem:[%s217_s8 + $0x10] sm:$0xff] %v2275_v52  ;;  %v2267_v46 = vadd.f32 %v2531_v8, %v2266_v22 }
 0x50f   : > { %v2751_v59 = vpop.f32.mrf.mxu0 }
 0x510   : > { %2297 = vst [vmem:[%s217_s8] sm:$0xff] %v2267_v46  ;;  %v2278_v60 = vadd.f32 %v2751_v59, %v2531_v8 }
 0x511   : > { %v2269_v37 = vpop.f32.mrf.mxu0 }
 0x512   : > { %2300 = vst [vmem:[%s217_s8 + $0x18] sm:$0xff] %v2278_v60  ;;  %v2270_v61 = vadd.f32 %v2531_v8, %v2269_v37 }
 0x514   : > { %2298 = vst [vmem:[%s217_s8 + $0x8] sm:$0xff] %v2270_v61 }
 0x523   : > { %v2754_v5 = vpop.f32.mrf.mxu0 }
 0x524   : > { %v2291_v4 = vadd.f32 %v2754_v5, %v2531_v8 }
 0x525   : > { %v2282_v9 = vpop.f32.mrf.mxu0 }
 0x526   : > { %2303 = vst [vmem:[%s217_s8 + $0x30] sm:$0xff] %v2291_v4  ;;  %v2283_v33 = vadd.f32 %v2531_v8, %v2282_v9 }
 0x527   : > { %v2755_v6 = vpop.f32.mrf.mxu0 }
 0x528   : > { %2301 = vst [vmem:[%s217_s8 + $0x20] sm:$0xff] %v2283_v33  ;;  %v2294_v48 = vadd.f32 %v2755_v6, %v2531_v8 }
 0x529   : > { %v2285_v42 = vpop.f32.mrf.mxu0 }
 0x52a   : > { %2304 = vst [vmem:[%s217_s8 + $0x38] sm:$0xff] %v2294_v48  ;;  %v2286_v30 = vadd.f32 %v2531_v8, %v2285_v42 }
 0x52c   : > { %2302 = vst [vmem:[%s217_s8 + $0x28] sm:$0xff] %v2286_v30 }
 0x52d   : > { %3230 = shalt.err (!%p3227_p3)
}
 0x52e   : > { %s3231_s23 = scalar_lea.hbm %s4082_s14, 1024  ;;  %s3235_s30 = scalar_lea.hbm %s4133_s5, 2048 }
 0x52f   : > { %p3232_p4 = scmp.ne.s32.totalorder %s4082_s14, %s3231_s23  ;;  %p3236_p9 = scmp.lt.s32.totalorder %s4082_s14, %s4133_s5 }
 0x530   : > { %p3237_p10 = scmp.lt.s32.totalorder %s3235_s30, %s3231_s23 }
 0x531   : > { %p3233_p7 = pnand %p3232_p4, %p3354_p5 }
 0x532   : > { %p3238_p11 = por %p3237_p10, %p3236_p9 }
 0x533   : > { %p3234_p8 = pneg %p3233_p7 }
 0x535   : > { %p3239_p12 = pnand %p3238_p11, %p3234_p8 }
 0x537   : > { %3242 = shalt.err (!%p3239_p12)
}
 0x538   : > { %s3284_s8 = smov 128   ;;  %s3285_s9 = smov 8  }
 0x539   : > { %2756 = dma.vmem_to_hbm [thread:$0]  (%p3354_p5), %s4084_s11, 1024, %s4082_s14, %s4088_s22, %s3284_s8, %s3284_s8, %s3285_s9  }
 0x53a PF: > { %p2762_p13 = scmp.ge.s32.totalorder %s3277_s21, 2  ;;  %s2334_s12 = sand.u32 1, %s3265_s18  }
 0x53b   : > { %s2335_s13 = scalar_lea.sflag [#allocation4], %s2334_s12 }
 0x53c   : > { %p2759_p0 = pnand %p2762_p13, %p3358_p6 }
 0x53e   : > { %p2760_p1 = pneg %p2759_p0 }
 0x540   : > { %3260 = dma.done.wait (%p2760_p1), %s2335_s13, 1024  }
 0x541   : > { %3262 = vsyncadd (%p2760_p1), %s2335_s13, 4294966272  ;;  %p15_p2 = scmp.ge.s32.totalorder %s3341_s24, 4   ;;  %s4136_s18 = smov %s3269_s19 }
 0x542   : > { %s4137_s19 = smov %s3273_s20  ;;  %s4138_s20 = smov %s3352_s27 }
 0x543   : > { %s4139_s21 = smov %s3341_s24  ;;  %17 = sbr.rel (!%p15_p2) target bundleno = 3 (0x3), region = 81 }
 0x548   :  { %2340 = vsyncpa [#allocation4], 1 }
 0x549   :  { %2342 = vsyncpa [#allocation4 + $0x1], 1 }

</bundles_post_ra>
